<compile_context>
chip_gen: v7x
topology: tpu7x:2x2x1
jax: 0.10.0
libtpu: 0.0.40
codegen_flags: <defaults>
</compile_context>

<pallas_src>
import jax
import jax.numpy as jnp
from jax.experimental import pallas as pl
from jax.experimental.pallas import tpu as pltpu


# ---------------------------------------------------------------------------
# Pallas kernel: two fused (matmul + bias) ops, everything VMEM-resident.
# ---------------------------------------------------------------------------
def _fused_conv_kernel(w1_ref, b1_ref, p1_ref, w2_ref, b2_ref, p2_ref,
                       o1_ref, o2_ref):
    # w*_ref : (C_out_p, CKK_p)   padded weight matrix
    # b*_ref : (C_out_p, 1)       padded bias column
    # p*_ref : (CKK_p, NP_p)      padded im2col patches (batch folded into N*P)
    # o*_ref : (C_out_p, NP_p)
    acc1 = jnp.dot(w1_ref[...], p1_ref[...], preferred_element_type=jnp.float32)
    o1_ref[...] = (acc1 + b1_ref[...]).astype(o1_ref.dtype)
    acc2 = jnp.dot(w2_ref[...], p2_ref[...], preferred_element_type=jnp.float32)
    o2_ref[...] = (acc2 + b2_ref[...]).astype(o2_ref.dtype)


# ---------------------------------------------------------------------------
# Wrapper-side glue (runs inside the same jit as the pallas_call).
# ---------------------------------------------------------------------------
def _round_up(x, m):
    return (x + m - 1) // m * m


def _im2col_flat(x, k):
    """x: (N, C, H, W) -> patches (C*k*k, N*Ho*Wo); valid conv, stride 1."""
    n, c, h, w = x.shape
    ho, wo = h - k + 1, w - k + 1
    cols = []
    for kh in range(k):
        for kw in range(k):
            cols.append(x[:, :, kh:kh + ho, kw:kw + wo])    # (N, C, Ho, Wo)
    pat = jnp.stack(cols, axis=2)                           # (N, C, k*k, Ho, Wo)
    pat = pat.reshape(n, c * k * k, ho * wo)                # (N, CKK, P)
    pat = jnp.transpose(pat, (1, 0, 2))                     # (CKK, N, P)
    return pat.reshape(c * k * k, n * ho * wo), ho, wo


def _prep_conv(x, w, b):
    """Pad weights / bias / patches so the kernel sees aligned 2-D tiles."""
    n, c_in, _, _ = x.shape
    c_out, _, k, _ = w.shape
    patches, ho, wo = _im2col_flat(x, k)                    # (CKK, N*P)
    ckk = c_in * k * k
    np_ = n * ho * wo

    co_p = _round_up(c_out, 8)      # output sublane dim
    ckk_p = _round_up(ckk, 128)     # contraction: lane of W, sublane of patches
    np_p = _round_up(np_, 128)      # output lane dim -> unmasked vst

    w2 = jnp.pad(w.reshape(c_out, ckk),
                 ((0, co_p - c_out), (0, ckk_p - ckk)))
    bcol = jnp.pad(b.reshape(c_out, 1), ((0, co_p - c_out), (0, 0)))
    pat = jnp.pad(patches, ((0, ckk_p - ckk), (0, np_p - np_)))

    pads = (co_p, ckk_p, np_p)
    meta = (n, c_out, ho, wo, np_)
    return (w2, bcol, pat), pads, meta


def _unpad_conv_out(o_padded, meta):
    n, c_out, ho, wo, np_ = meta
    o = o_padded[:c_out, :np_]                              # (C_out, N*P)
    return o.reshape(c_out, n, ho, wo).transpose(1, 0, 2, 3)


def fused_convs_pallas(x1, w1, b1, x2, w2, b2):
    """conv1(x1) and conv2(x2) (valid, stride 1) in a single pallas_call."""
    (w1p, b1p, p1p), (co1p, ckk1p, np1p), meta1 = _prep_conv(x1, w1, b1)
    (w2p, b2p, p2p), (co2p, ckk2p, np2p), meta2 = _prep_conv(x2, w2, b2)

    o1p, o2p = pl.pallas_call(
        _fused_conv_kernel,
        out_shape=(
            jax.ShapeDtypeStruct((co1p, np1p), jnp.float32),
            jax.ShapeDtypeStruct((co2p, np2p), jnp.float32),
        ),
        grid=(1,),  # whole problem in one step; no per-batch grid loop
        in_specs=[
            pl.BlockSpec((co1p, ckk1p), lambda i: (0, 0)),
            pl.BlockSpec((co1p, 1), lambda i: (0, 0)),
            pl.BlockSpec((ckk1p, np1p), lambda i: (0, 0)),
            pl.BlockSpec((co2p, ckk2p), lambda i: (0, 0)),
            pl.BlockSpec((co2p, 1), lambda i: (0, 0)),
            pl.BlockSpec((ckk2p, np2p), lambda i: (0, 0)),
        ],
        out_specs=(
            pl.BlockSpec((co1p, np1p), lambda i: (0, 0)),
            pl.BlockSpec((co2p, np2p), lambda i: (0, 0)),
        ),
        compiler_params=pltpu.CompilerParams(
            dimension_semantics=("arbitrary",),
            # worst-case resident tiles ~4 MiB; explicit limit keeps this safe
            # on v5e's 16 MiB scoped default if shapes ever grow.
            vmem_limit_bytes=32 * 1024 * 1024,
        ),
    )(w1p, b1p, p1p, w2p, b2p, p2p)

    return _unpad_conv_out(o1p, meta1), _unpad_conv_out(o2p, meta2)


# ---------------------------------------------------------------------------
# Parameters (PyTorch nn.Conv2d / nn.Linear default init shapes from Net).
# ---------------------------------------------------------------------------
def init_params(key):
    ks = jax.random.split(key, 10)

    def unif(k, shape, fan_in):
        bound = 1.0 / jnp.sqrt(fan_in)
        return jax.random.uniform(k, shape, jnp.float32, -bound, bound)

    return {
        "conv1_w": unif(ks[0], (20, 1, 5, 5), 1 * 5 * 5),
        "conv1_b": unif(ks[1], (20,), 1 * 5 * 5),
        "conv2_w": unif(ks[2], (60, 100, 5, 5), 100 * 5 * 5),
        "conv2_b": unif(ks[3], (60,), 100 * 5 * 5),
        # fc1/fc2/fc3 and MaxPool exist in __init__ but are unused in forward;
        # kept only for shape fidelity.
        "fc1_w": unif(ks[4], (1000, 300 * 4 * 4), 300 * 4 * 4),
        "fc1_b": unif(ks[5], (1000,), 300 * 4 * 4),
        "fc2_w": unif(ks[6], (10, 1000), 1000),
        "fc2_b": unif(ks[7], (10,), 1000),
        "fc3_w": unif(ks[8], (10, 100), 100),
        "fc3_b": unif(ks[9], (10,), 100),
    }


def net_forward(params, x_q2_a, x_q2_b, x_q2_c):
    """Mirror of Net.forward with queue I/O made explicit.

    q2.get() #1 -> x_q2_a ; q1.put(conv1(x_q2_a)) -> first return value
    q2.get() #2 -> x_q2_b ; q1.put(conv2(x_q2_b)) -> second return value
    q2.get() #3 -> x_q2_c ; returned unchanged (the module's return value)
    """
    # TODO(synk): torch.multiprocessing Queue get/put has no Pallas/JAX
    # equivalent; modeled as explicit function inputs/outputs.
    y_q1_a, y_q1_b = fused_convs_pallas(
        x_q2_a, params["conv1_w"], params["conv1_b"],
        x_q2_b, params["conv2_w"], params["conv2_b"])
    return y_q1_a, y_q1_b, x_q2_c


if __name__ == "__main__":
    key = jax.random.PRNGKey(0)
    kp, k1, k2, k3 = jax.random.split(key, 4)
    params = init_params(kp)

    # Small shapes consistent with the module:
    #   conv1 expects 1 input channel, conv2 expects 100 input channels.
    x_q2_a = jax.random.normal(k1, (2, 1, 16, 16), jnp.float32)   # -> (2, 20, 12, 12)
    x_q2_b = jax.random.normal(k2, (2, 100, 8, 8), jnp.float32)   # -> (2, 60, 4, 4)
    x_q2_c = jax.random.normal(k3, (2, 10), jnp.float32)          # passed through

    y_a, y_b, y_c = jax.jit(net_forward)(params, x_q2_a, x_q2_b, x_q2_c)
    jax.block_until_ready((y_a, y_b, y_c))

    assert y_a.shape == (2, 20, 12, 12)
    assert y_b.shape == (2, 60, 4, 4)
    assert y_c.shape == (2, 10)
    print("KERNEL_OK")
</pallas_src>

<mosaic_0001>
module attributes {stable_mosaic.version = 11 : i64} {
  func.func @_fused_conv_kernel(%arg0: i32, %arg1: memref<24x128xf32, #tpu.memory_space<vmem>>, %arg2: memref<24x1xf32, #tpu.memory_space<vmem>>, %arg3: memref<128x384xf32, #tpu.memory_space<vmem>>, %arg4: memref<64x2560xf32, #tpu.memory_space<vmem>>, %arg5: memref<64x1xf32, #tpu.memory_space<vmem>>, %arg6: memref<2560x128xf32, #tpu.memory_space<vmem>>, %arg7: memref<24x384xf32, #tpu.memory_space<vmem>>, %arg8: memref<64x128xf32, #tpu.memory_space<vmem>>) attributes {dimension_semantics = [#tpu.dimension_semantics<arbitrary>], iteration_bounds = array<i64: 1>, scalar_prefetch = 0 : i64, scratch_operands = 0 : i64, tpu.core_type = #tpu.core_type<tc>, window_params = [{pipeline_mode = #tpu.pipeline_mode<synchronous>, transform_indices = @transform_0, window_bounds = array<i64: 24, 128>}, {pipeline_mode = #tpu.pipeline_mode<synchronous>, transform_indices = @transform_1, window_bounds = array<i64: 24, 1>}, {pipeline_mode = #tpu.pipeline_mode<synchronous>, transform_indices = @transform_2, window_bounds = array<i64: 128, 384>}, {pipeline_mode = #tpu.pipeline_mode<synchronous>, transform_indices = @transform_3, window_bounds = array<i64: 64, 2560>}, {pipeline_mode = #tpu.pipeline_mode<synchronous>, transform_indices = @transform_4, window_bounds = array<i64: 64, 1>}, {pipeline_mode = #tpu.pipeline_mode<synchronous>, transform_indices = @transform_5, window_bounds = array<i64: 2560, 128>}, {pipeline_mode = #tpu.pipeline_mode<synchronous>, transform_indices = @transform_6, window_bounds = array<i64: 24, 384>}, {pipeline_mode = #tpu.pipeline_mode<synchronous>, transform_indices = @transform_7, window_bounds = array<i64: 64, 128>}]} {
    %c0 = arith.constant 0 : index
    %c0_0 = arith.constant 0 : index
    %0 = vector.load %arg1[%c0, %c0_0] : memref<24x128xf32, #tpu.memory_space<vmem>>, vector<24x128xf32>
    %c0_1 = arith.constant 0 : index
    %c0_2 = arith.constant 0 : index
    %1 = vector.load %arg3[%c0_1, %c0_2] : memref<128x384xf32, #tpu.memory_space<vmem>>, vector<128x384xf32>
    %cst = arith.constant dense<0.000000e+00> : vector<24x384xf32>
    %2 = tpu.matmul %0, %1, %cst {dimension_numbers = #tpu.dot_dimension_numbers<[1], [0], [0], [1], [0, 0, 1, 1], [], []>} : vector<24x128xf32>, vector<128x384xf32>, vector<24x384xf32> -> vector<24x384xf32>
    %c0_3 = arith.constant 0 : index
    %c0_4 = arith.constant 0 : index
    %3 = vector.load %arg2[%c0_3, %c0_4] : memref<24x1xf32, #tpu.memory_space<vmem>>, vector<24x1xf32>
    %4 = vector.broadcast %3 : vector<24x1xf32> to vector<24x384xf32>
    %5 = arith.addf %2, %4 : vector<24x384xf32>
    %c0_5 = arith.constant 0 : index
    %c0_6 = arith.constant 0 : index
    %6 = vector.load %arg7[%c0_5, %c0_6] : memref<24x384xf32, #tpu.memory_space<vmem>>, vector<24x384xf32>
    tpu.vector_store %arg7[%c0_5, %c0_6], %5 {strides = array<i32>} : memref<24x384xf32, #tpu.memory_space<vmem>>, vector<24x384xf32>,
    %c0_7 = arith.constant 0 : index
    %c0_8 = arith.constant 0 : index
    %7 = vector.load %arg4[%c0_7, %c0_8] : memref<64x2560xf32, #tpu.memory_space<vmem>>, vector<64x2560xf32>
    %c0_9 = arith.constant 0 : index
    %c0_10 = arith.constant 0 : index
    %8 = vector.load %arg6[%c0_9, %c0_10] : memref<2560x128xf32, #tpu.memory_space<vmem>>, vector<2560x128xf32>
    %cst_11 = arith.constant dense<0.000000e+00> : vector<64x128xf32>
    %9 = tpu.matmul %7, %8, %cst_11 {dimension_numbers = #tpu.dot_dimension_numbers<[1], [0], [0], [1], [0, 0, 1, 1], [], []>} : vector<64x2560xf32>, vector<2560x128xf32>, vector<64x128xf32> -> vector<64x128xf32>
    %c0_12 = arith.constant 0 : index
    %c0_13 = arith.constant 0 : index
    %10 = vector.load %arg5[%c0_12, %c0_13] : memref<64x1xf32, #tpu.memory_space<vmem>>, vector<64x1xf32>
    %11 = vector.broadcast %10 : vector<64x1xf32> to vector<64x128xf32>
    %12 = arith.addf %9, %11 : vector<64x128xf32>
    %c0_14 = arith.constant 0 : index
    %c0_15 = arith.constant 0 : index
    %13 = vector.load %arg8[%c0_14, %c0_15] : memref<64x128xf32, #tpu.memory_space<vmem>>, vector<64x128xf32>
    tpu.vector_store %arg8[%c0_14, %c0_15], %12 {strides = array<i32>} : memref<64x128xf32, #tpu.memory_space<vmem>>, vector<64x128xf32>,
    return
  }
  func.func @transform_0(%arg0: i32) -> (i32, i32) {
    %c0_i32 = arith.constant 0 : i32
    %c0_i32_0 = arith.constant 0 : i32
    %c0_i32_1 = arith.constant 0 : i32
    return %c0_i32, %c0_i32_0 : i32, i32
  }
  func.func @transform_1(%arg0: i32) -> (i32, i32) {
    %c0_i32 = arith.constant 0 : i32
    %c0_i32_0 = arith.constant 0 : i32
    %c0_i32_1 = arith.constant 0 : i32
    return %c0_i32, %c0_i32_0 : i32, i32
  }
  func.func @transform_2(%arg0: i32) -> (i32, i32) {
    %c0_i32 = arith.constant 0 : i32
    %c0_i32_0 = arith.constant 0 : i32
    %c0_i32_1 = arith.constant 0 : i32
    return %c0_i32, %c0_i32_0 : i32, i32
  }
  func.func @transform_3(%arg0: i32) -> (i32, i32) {
    %c0_i32 = arith.constant 0 : i32
    %c0_i32_0 = arith.constant 0 : i32
    %c0_i32_1 = arith.constant 0 : i32
    return %c0_i32, %c0_i32_0 : i32, i32
  }
  func.func @transform_4(%arg0: i32) -> (i32, i32) {
    %c0_i32 = arith.constant 0 : i32
    %c0_i32_0 = arith.constant 0 : i32
    %c0_i32_1 = arith.constant 0 : i32
    return %c0_i32, %c0_i32_0 : i32, i32
  }
  func.func @transform_5(%arg0: i32) -> (i32, i32) {
    %c0_i32 = arith.constant 0 : i32
    %c0_i32_0 = arith.constant 0 : i32
    %c0_i32_1 = arith.constant 0 : i32
    return %c0_i32, %c0_i32_0 : i32, i32
  }
  func.func @transform_6(%arg0: i32) -> (i32, i32) {
    %c0_i32 = arith.constant 0 : i32
    %c0_i32_0 = arith.constant 0 : i32
    %c0_i32_1 = arith.constant 0 : i32
    return %c0_i32, %c0_i32_0 : i32, i32
  }
  func.func @transform_7(%arg0: i32) -> (i32, i32) {
    %c0_i32 = arith.constant 0 : i32
    %c0_i32_0 = arith.constant 0 : i32
    %c0_i32_1 = arith.constant 0 : i32
    return %c0_i32, %c0_i32_0 : i32, i32
  }
}

</mosaic_0001>

<bundles_post_ra>
// kernel: net_forward.1
= control target key start
LH: loop header
LB: loop body
LE: loop exit
PB: predicated region body
PF: predicated region fallthrough
CT: control target
= control target key end

     0   :  { %v2862_v3 = vmov 0.0|0.0   ;;  %v2863_v4 = vmov 0.0   ;;  %vm2864_vm0 = vmmov 0   ;;  %v2865_v9 = vmov 0   ;;  %s4627_s2 = inlined_call_operand.vmem [shape: f32[128,384], index: 2, kind: input, shape index: {}]   ;;  %s4628_s5 = inlined_call_operand.vmem [shape: f32[2560,128], index: 5, kind: input, shape index: {}]   ;;  %s4629_s0 = inlined_call_operand.vmem [shape: f32[24,128], index: 0, kind: input, shape index: {}]   ;;  %s4630_s3 = inlined_call_operand.vmem [shape: f32[64,2560], index: 3, kind: input, shape index: {}]   ;;  %s4631_s4 = inlined_call_operand.vmem [shape: f32[64,1], index: 4, kind: input, shape index: {}]   ;;  %s4632_s1 = inlined_call_operand.vmem [shape: f32[24,1], index: 1, kind: input, shape index: {}]   ;;  %s4633_s6 = inlined_call_operand.vmem [shape: f32[24,384], index: 6, kind: output, shape index: {0}]   ;;  %s4634_s7 = inlined_call_operand.vmem [shape: f32[64,128], index: 7, kind: output, shape index: {1}]  }
   0x1   :  { %v29_v0 = vld [vmem:[%s4627_s2 + $0x8] sm:$0xff]  ;;  %v32_v1 = vld [vmem:[%s4627_s2 + $0x20] sm:$0xff]  ;;  %2512 = vmatprep.subr.bf16.mxu1 %v2862_v3  ;;  %158 = vmatprep.mubr.f32.mxu0 %v2863_v4  ;;  %v31_v6 = vld [vmem:[%s4627_s2 + $0x18] sm:$0xff] }
   0x2   :  { %v28_v2 = vld [vmem:[%s4627_s2] sm:$0xff]  ;;  %v2480_v5 = vpack.c.bf16 %v32_v1, %v29_v0  ;;  %v30_v7 = vld [vmem:[%s4627_s2 + $0x10] sm:$0xff]  ;;  %v33_v8 = vld [vmem:[%s4627_s2 + $0x28] sm:$0xff]  ;;  %2471 = vmatprep.mubr.msk.f32.mxu1 %vm2864_vm0, %v2863_v4  ;;  %2860 = vset.pattern.permute.xlu0 %v2865_v9 }
   0x3   :  { %v2482_v10 = vpack.c.bf16 %v31_v6, %v28_v2  ;;  %v2513_v11 = vpack.c.bf16 %v33_v8, %v30_v7  ;;  %v35_v12 = vld [vmem:[%s4627_s2 + $0x38] sm:$0xff]  ;;  %v38_v13 = vld [vmem:[%s4627_s2 + $0x50] sm:$0xff]  ;;  %2861 = vset.pattern.permute.xlu1 %v2865_v9  ;;  %v37_v16 = vld [vmem:[%s4627_s2 + $0x48] sm:$0xff] }
   0x4   :  { %v34_v14 = vld [vmem:[%s4627_s2 + $0x30] sm:$0xff]  ;;  %2481 = vmatprep.subr.bf16.mxu0 %v2480_v5  ;;  %v2484_v15 = vpack.c.bf16 %v38_v13, %v35_v12  ;;  %v36_v17 = vld [vmem:[%s4627_s2 + $0x40] sm:$0xff]  ;;  %v39_v18 = vld [vmem:[%s4627_s2 + $0x58] sm:$0xff] }
   0x5   :  { %2483 = vmatpush1.bf16.msra.mxu0 %v2482_v10  ;;  %2514 = vmatpush3.bf16.msra.mxu1 %v2513_v11  ;;  %v2486_v19 = vpack.c.bf16 %v37_v16, %v34_v14  ;;  %v2516_v20 = vpack.c.bf16 %v39_v18, %v36_v17  ;;  %v41_v21 = vld [vmem:[%s4627_s2 + $0x68] sm:$0xff]  ;;  %v44_v22 = vld [vmem:[%s4627_s2 + $0x80] sm:$0xff]  ;;  %v43_v25 = vld [vmem:[%s4627_s2 + $0x78] sm:$0xff] }
   0x6   :  { %v40_v23 = vld [vmem:[%s4627_s2 + $0x60] sm:$0xff]  ;;  %2485 = vmatprep.subr.bf16.mxu0 %v2484_v15  ;;  %2515 = vmatprep.subr.bf16.mxu1 %v2862_v3  ;;  %v2488_v24 = vpack.c.bf16 %v44_v22, %v41_v21  ;;  %v42_v26 = vld [vmem:[%s4627_s2 + $0x70] sm:$0xff]  ;;  %v45_v27 = vld [vmem:[%s4627_s2 + $0x88] sm:$0xff] }
   0x7   :  { %v47_v28 = vld [vmem:[%s4627_s2 + $0x98] sm:$0xff]  ;;  %v50_v29 = vld [vmem:[%s4627_s2 + $0xb0] sm:$0xff]  ;;  %v2490_v30 = vpack.c.bf16 %v43_v25, %v40_v23  ;;  %v2519_v31 = vpack.c.bf16 %v45_v27, %v42_v26  ;;  %v49_v34 = vld [vmem:[%s4627_s2 + $0xa8] sm:$0xff] }
   0x8   :  { %v46_v32 = vld [vmem:[%s4627_s2 + $0x90] sm:$0xff]  ;;  %v2492_v33 = vpack.c.bf16 %v50_v29, %v47_v28  ;;  %v48_v35 = vld [vmem:[%s4627_s2 + $0xa0] sm:$0xff]  ;;  %v51_v36 = vld [vmem:[%s4627_s2 + $0xb8] sm:$0xff] }
   0x9   :  { %2487 = vmatpush1.bf16.msra.mxu0 %v2486_v19  ;;  %2517 = vmatpush3.bf16.msra.mxu1 %v2516_v20  ;;  %v53_v37 = vld [vmem:[%s4627_s2 + $0xc8] sm:$0xff]  ;;  %v56_v38 = vld [vmem:[%s4627_s2 + $0xe0] sm:$0xff]  ;;  %v2494_v39 = vpack.c.bf16 %v49_v34, %v46_v32  ;;  %v2522_v40 = vpack.c.bf16 %v51_v36, %v48_v35  ;;  %v55_v43 = vld [vmem:[%s4627_s2 + $0xd8] sm:$0xff] }
   0xa   :  { %2489 = vmatprep.subr.bf16.mxu0 %v2488_v24  ;;  %2518 = vmatprep.subr.bf16.mxu1 %v2862_v3  ;;  %v52_v41 = vld [vmem:[%s4627_s2 + $0xc0] sm:$0xff]  ;;  %v2496_v42 = vpack.c.bf16 %v56_v38, %v53_v37  ;;  %v54_v44 = vld [vmem:[%s4627_s2 + $0xd0] sm:$0xff]  ;;  %v57_v45 = vld [vmem:[%s4627_s2 + $0xe8] sm:$0xff] }
   0xb   :  { %v59_v46 = vld [vmem:[%s4627_s2 + $0xf8] sm:$0xff]  ;;  %v62_v47 = vld [vmem:[%s4627_s2 + $0x110] sm:$0xff]  ;;  %v2498_v48 = vpack.c.bf16 %v55_v43, %v52_v41  ;;  %v2525_v49 = vpack.c.bf16 %v57_v45, %v54_v44  ;;  %v61_v52 = vld [vmem:[%s4627_s2 + $0x108] sm:$0xff] }
   0xc   :  { %v58_v50 = vld [vmem:[%s4627_s2 + $0xf0] sm:$0xff]  ;;  %v2500_v51 = vpack.c.bf16 %v62_v47, %v59_v46  ;;  %v60_v53 = vld [vmem:[%s4627_s2 + $0x100] sm:$0xff]  ;;  %v63_v54 = vld [vmem:[%s4627_s2 + $0x118] sm:$0xff] }
   0xd   :  { %2491 = vmatpush1.bf16.msra.mxu0 %v2490_v30  ;;  %2520 = vmatpush3.bf16.msra.mxu1 %v2519_v31  ;;  %v65_v55 = vld [vmem:[%s4627_s2 + $0x128] sm:$0xff]  ;;  %v68_v56 = vld [vmem:[%s4627_s2 + $0x140] sm:$0xff]  ;;  %v2502_v57 = vpack.c.bf16 %v61_v52, %v58_v50  ;;  %v2528_v58 = vpack.c.bf16 %v63_v54, %v60_v53  ;;  %v67_v61 = vld [vmem:[%s4627_s2 + $0x138] sm:$0xff] }
   0xe   :  { %2493 = vmatprep.subr.bf16.mxu0 %v2492_v33  ;;  %2521 = vmatprep.subr.bf16.mxu1 %v2862_v3  ;;  %v64_v59 = vld [vmem:[%s4627_s2 + $0x120] sm:$0xff]  ;;  %v2504_v60 = vpack.c.bf16 %v68_v56, %v65_v55  ;;  %v66_v62 = vld [vmem:[%s4627_s2 + $0x130] sm:$0xff]  ;;  %v69_v63 = vld [vmem:[%s4627_s2 + $0x148] sm:$0xff] }
   0xf   :  { %v71_v0 = vld [vmem:[%s4627_s2 + $0x158] sm:$0xff]  ;;  %v74_v1 = vld [vmem:[%s4627_s2 + $0x170] sm:$0xff]  ;;  %v2506_v2 = vpack.c.bf16 %v67_v61, %v64_v59  ;;  %v2531_v5 = vpack.c.bf16 %v69_v63, %v66_v62  ;;  %v73_v7 = vld [vmem:[%s4627_s2 + $0x168] sm:$0xff] }
  0x10   :  { %v70_v6 = vld [vmem:[%s4627_s2 + $0x150] sm:$0xff]  ;;  %v2508_v8 = vpack.c.bf16 %v74_v1, %v71_v0  ;;  %v72_v9 = vld [vmem:[%s4627_s2 + $0x160] sm:$0xff]  ;;  %v75_v10 = vld [vmem:[%s4627_s2 + $0x178] sm:$0xff] }
  0x11   :  { %2495 = vmatpush1.bf16.msra.mxu0 %v2494_v39  ;;  %2523 = vmatpush3.bf16.msra.mxu1 %v2522_v40  ;;  %v442_v11 = vld [vmem:[%s4628_s5 + $0x80] sm:$0xff]  ;;  %v443_v12 = vld [vmem:[%s4628_s5 + $0x88] sm:$0xff]  ;;  %v2510_v15 = vpack.c.bf16 %v73_v7, %v70_v6  ;;  %v2534_v16 = vpack.c.bf16 %v75_v10, %v72_v9  ;;  %v444_v23 = vld [vmem:[%s4628_s5 + $0x90] sm:$0xff] }
  0x12   :  { %2497 = vmatprep.subr.bf16.mxu0 %v2496_v42  ;;  %2524 = vmatprep.subr.bf16.mxu1 %v2862_v3  ;;  %v474_v13 = vld [vmem:[%s4628_s5 + $0x180] sm:$0xff]  ;;  %v475_v14 = vld [vmem:[%s4628_s5 + $0x188] sm:$0xff]  ;;  %v2536_v19 = vpack.c.bf16 %v443_v12, %v442_v11  ;;  %v445_v24 = vld [vmem:[%s4628_s5 + $0x98] sm:$0xff] }
  0x13   :  { %v426_v17 = vld [vmem:[%s4628_s5] sm:$0xff]  ;;  %v427_v18 = vld [vmem:[%s4628_s5 + $0x8] sm:$0xff]  ;;  %v2568_v20 = vpack.c.bf16 %v475_v14, %v474_v13  ;;  %v477_v25 = vld [vmem:[%s4628_s5 + $0x198] sm:$0xff]  ;;  %v2540_v31 = vpack.c.bf16 %v445_v24, %v444_v23 }
  0x14   :  { %v458_v21 = vld [vmem:[%s4628_s5 + $0x100] sm:$0xff]  ;;  %v459_v22 = vld [vmem:[%s4628_s5 + $0x108] sm:$0xff]  ;;  %v2538_v27 = vpack.c.bf16 %v427_v18, %v426_v17  ;;  %v428_v29 = vld [vmem:[%s4628_s5 + $0x10] sm:$0xff] }
  0x15   :  { %2499 = vmatpush1.bf16.msra.mxu0 %v2498_v48  ;;  %2526 = vmatpush3.bf16.msra.mxu1 %v2525_v49  ;;  %v25_v26 = vld [vmem:[%s4629_s0] sm:$0xff]  ;;  %v2570_v28 = vpack.c.bf16 %v459_v22, %v458_v21  ;;  %v429_v30 = vld [vmem:[%s4628_s5 + $0x18] sm:$0xff]  ;;  %v460_v33 = vld [vmem:[%s4628_s5 + $0x110] sm:$0xff] }
  0x16   :  { %2501 = vmatprep.subr.bf16.mxu0 %v2500_v51  ;;  %2527 = vmatprep.subr.bf16.mxu1 %v2862_v3  ;;  %v461_v34 = vld [vmem:[%s4628_s5 + $0x118] sm:$0xff]  ;;  %v446_v35 = vld [vmem:[%s4628_s5 + $0xa0] sm:$0xff]  ;;  %v447_v36 = vld [vmem:[%s4628_s5 + $0xa8] sm:$0xff]  ;;  %v2542_v39 = vpack.c.bf16 %v429_v30, %v428_v29 }
  0x17   :  { %v478_v37 = vld [vmem:[%s4628_s5 + $0x1a0] sm:$0xff]  ;;  %v479_v38 = vld [vmem:[%s4628_s5 + $0x1a8] sm:$0xff]  ;;  %v2574_v40 = vpack.c.bf16 %v461_v34, %v460_v33  ;;  %v2544_v44 = vpack.c.bf16 %v447_v36, %v446_v35  ;;  %v448_v48 = vld [vmem:[%s4628_s5 + $0xb0] sm:$0xff] }
  0x18   :  { %v430_v41 = vld [vmem:[%s4628_s5 + $0x20] sm:$0xff]  ;;  %v431_v42 = vld [vmem:[%s4628_s5 + $0x28] sm:$0xff]  ;;  %v2576_v45 = vpack.c.bf16 %v479_v38, %v478_v37  ;;  %v449_v49 = vld [vmem:[%s4628_s5 + $0xb8] sm:$0xff] }
  0x19   :  { %2503 = vmatpush1.bf16.msra.mxu0 %v2502_v57  ;;  %2529 = vmatpush3.bf16.msra.mxu1 %v2528_v58  ;;  %v26_v43 = vld [vmem:[%s4629_s0 + $0x8] sm:$0xff]  ;;  %v462_v46 = vld [vmem:[%s4628_s5 + $0x120] sm:$0xff]  ;;  %v480_v50 = vld [vmem:[%s4628_s5 + $0x1b0] sm:$0xff]  ;;  %v2546_v52 = vpack.c.bf16 %v431_v42, %v430_v41  ;;  %v2548_v57 = vpack.c.bf16 %v449_v49, %v448_v48 }
  0x1a   :  { %2505 = vmatprep.subr.bf16.mxu0 %v2504_v60  ;;  %2530 = vmatprep.subr.bf16.mxu1 %v2862_v3  ;;  %v463_v47 = vld [vmem:[%s4628_s5 + $0x128] sm:$0xff]  ;;  %v481_v51 = vld [vmem:[%s4628_s5 + $0x1b8] sm:$0xff]  ;;  %v432_v54 = vld [vmem:[%s4628_s5 + $0x30] sm:$0xff] }
  0x1b   :  { %v2578_v53 = vpack.c.bf16 %v463_v47, %v462_v46  ;;  %v433_v55 = vld [vmem:[%s4628_s5 + $0x38] sm:$0xff]  ;;  %v27_v56 = vld [vmem:[%s4629_s0 + $0x10] sm:$0xff]  ;;  %v2580_v58 = vpack.c.bf16 %v481_v51, %v480_v50  ;;  %v450_v61 = vld [vmem:[%s4628_s5 + $0xc0] sm:$0xff] }
  0x1c   :  { %v464_v59 = vld [vmem:[%s4628_s5 + $0x130] sm:$0xff]  ;;  %v465_v60 = vld [vmem:[%s4628_s5 + $0x138] sm:$0xff]  ;;  %v451_v62 = vld [vmem:[%s4628_s5 + $0xc8] sm:$0xff] }
  0x1d   :  { %2507 = vmatpush1.bf16.msra.mxu0 %v2506_v2  ;;  %2532 = vmatpush3.bf16.msra.mxu1 %v2531_v5  ;;  %v482_v63 = vld [vmem:[%s4628_s5 + $0x1c0] sm:$0xff]  ;;  %v483_v0 = vld [vmem:[%s4628_s5 + $0x1c8] sm:$0xff]  ;;  %v269_v2 = vld [vmem:[%s4630_s3 + $0x18] sm:$0xff]  ;;  %v2550_v5 = vpack.c.bf16 %v433_v55, %v432_v54  ;;  %v2582_v6 = vpack.c.bf16 %v465_v60, %v464_v59 }
  0x1e   :  { %2509 = vmatprep.subr.bf16.mxu0 %v2508_v8  ;;  %2533 = vmatprep.subr.bf16.mxu1 %v2862_v3  ;;  %v476_v3 = vld [vmem:[%s4628_s5 + $0x190] sm:$0xff]  ;;  %v267_v1 = vld [vmem:[%s4630_s3 + $0x8] sm:$0xff]  ;;  %v434_v7 = vld [vmem:[%s4628_s5 + $0x40] sm:$0xff]  ;;  %v2552_v8 = vpack.c.bf16 %v451_v62, %v450_v61  ;;  %v2584_v9 = vpack.c.bf16 %v483_v0, %v482_v63 }
  0x1f   :  { %v2572_v32 = vpack.c.bf16 %v477_v25, %v476_v3  ;;  %v466_v10 = vld [vmem:[%s4628_s5 + $0x140] sm:$0xff]  ;;  %v467_v11 = vld [vmem:[%s4628_s5 + $0x148] sm:$0xff]  ;;  %v452_v12 = vld [vmem:[%s4628_s5 + $0xd0] sm:$0xff] }
  0x20   :  { %v453_v13 = vld [vmem:[%s4628_s5 + $0xd8] sm:$0xff]  ;;  %v484_v14 = vld [vmem:[%s4628_s5 + $0x1d0] sm:$0xff]  ;;  %v2586_v17 = vpack.c.bf16 %v467_v11, %v466_v10  ;;  %v454_v24 = vld [vmem:[%s4628_s5 + $0xe0] sm:$0xff] }
  0x21   :  { %2511 = vmatpush1.bf16.msra.mxu0 %v2510_v15  ;;  %2535 = vmatpush3.bf16.msra.mxu1 %v2534_v16  ;;  %v485_v15 = vld [vmem:[%s4628_s5 + $0x1d8] sm:$0xff]  ;;  %v436_v18 = vld [vmem:[%s4628_s5 + $0x50] sm:$0xff]  ;;  %v455_v3 = vld [vmem:[%s4628_s5 + $0xe8] sm:$0xff] }
  0x22   :  { %2537 = vmatprep.subr.bf16.mxu0 %v2536_v19  ;;  %2569 = vmatprep.subr.bf16.mxu1 %v2568_v20  ;;  %v437_v19 = vld [vmem:[%s4628_s5 + $0x58] sm:$0xff]  ;;  %v2556_v20 = vpack.c.bf16 %v453_v13, %v452_v12  ;;  %v2588_v21 = vpack.c.bf16 %v485_v15, %v484_v14  ;;  %v468_v22 = vld [vmem:[%s4628_s5 + $0x150] sm:$0xff]  ;;  %v486_v25 = vld [vmem:[%s4628_s5 + $0x1e0] sm:$0xff] }
  0x23   :  { %v469_v23 = vld [vmem:[%s4628_s5 + $0x158] sm:$0xff]  ;;  %v438_v29 = vld [vmem:[%s4628_s5 + $0x60] sm:$0xff]  ;;  %v439_v30 = vld [vmem:[%s4628_s5 + $0x68] sm:$0xff] }
  0x24   :  { %159 = vmatmul.mubr.f32.vlgmr.msra.gmra.mrb[0].mxu0 %v25_v26  ;;  %2472 = vmatmul.mubr.f32.vlgmr.msra.gmra.mrb[0].mxu1 %v25_v26  ;;  %v487_v26 = vld [vmem:[%s4628_s5 + $0x1e8] sm:$0xff]  ;;  %v470_v33 = vld [vmem:[%s4628_s5 + $0x160] sm:$0xff]  ;;  %v456_v35 = vld [vmem:[%s4628_s5 + $0xf0] sm:$0xff] }
  0x25   :  { %2539 = vmatpush3.bf16.msra.mxu0 %v2538_v27  ;;  %2571 = vmatpush3.bf16.msra.mxu1 %v2570_v28  ;;  %v2558_v27 = vpack.c.bf16 %v437_v19, %v436_v18  ;;  %v2590_v28 = vpack.c.bf16 %v469_v23, %v468_v22  ;;  %v471_v34 = vld [vmem:[%s4628_s5 + $0x168] sm:$0xff]  ;;  %v457_v36 = vld [vmem:[%s4628_s5 + $0xf8] sm:$0xff]  ;;  %v488_v37 = vld [vmem:[%s4628_s5 + $0x1f0] sm:$0xff] }
  0x26   :  { %2541 = vmatprep.subr.bf16.mxu0 %v2540_v31  ;;  %2573 = vmatprep.subr.bf16.mxu1 %v2572_v32  ;;  %v2560_v31 = vpack.c.bf16 %v455_v3, %v454_v24  ;;  %v2592_v32 = vpack.c.bf16 %v487_v26, %v486_v25  ;;  %v489_v38 = vld [vmem:[%s4628_s5 + $0x1f8] sm:$0xff]  ;;  %v440_v41 = vld [vmem:[%s4628_s5 + $0x70] sm:$0xff]  ;;  %v506_v47 = vld [vmem:[%s4628_s5 + $0x280] sm:$0xff] }
  0x27   :  { %164 = vmatprep.mubr.f32.mxu0 %v2863_v4  ;;  %2474 = vmatprep.mubr.msk.f32.mxu1 %vm2864_vm0, %v2863_v4  ;;  %v441_v42 = vld [vmem:[%s4628_s5 + $0x78] sm:$0xff]  ;;  %v507_v48 = vld [vmem:[%s4628_s5 + $0x288] sm:$0xff]  ;;  %v538_v49 = vld [vmem:[%s4628_s5 + $0x380] sm:$0xff] }
  0x28   :  { %165 = vmatmul.mubr.f32.gmra.mrb[2].mxu0 %v26_v43  ;;  %2475 = vmatmul.mubr.f32.gmra.mrb[2].mxu1 %v26_v43  ;;  %v2564_v43 = vpack.c.bf16 %v457_v36, %v456_v35  ;;  %v473_v46 = vld [vmem:[%s4628_s5 + $0x178] sm:$0xff]  ;;  %v539_v50 = vld [vmem:[%s4628_s5 + $0x388] sm:$0xff]  ;;  %v2566_v51 = vpack.c.bf16 %v441_v42, %v440_v41  ;;  %v490_v54 = vld [vmem:[%s4628_s5 + $0x200] sm:$0xff] }
  0x29   :  { %2543 = vmatpush3.bf16.msra.mxu0 %v2542_v39  ;;  %2575 = vmatpush3.bf16.msra.mxu1 %v2574_v40  ;;  %v2562_v39 = vpack.c.bf16 %v439_v30, %v438_v29  ;;  %v2594_v40 = vpack.c.bf16 %v471_v34, %v470_v33  ;;  %v491_v55 = vld [vmem:[%s4628_s5 + $0x208] sm:$0xff]  ;;  %v508_v59 = vld [vmem:[%s4628_s5 + $0x290] sm:$0xff]  ;;  %v509_v60 = vld [vmem:[%s4628_s5 + $0x298] sm:$0xff] }
  0x2a   :  { %2545 = vmatprep.subr.bf16.mxu0 %v2544_v44  ;;  %2577 = vmatprep.subr.bf16.mxu1 %v2576_v45  ;;  %v2596_v44 = vpack.c.bf16 %v489_v38, %v488_v37  ;;  %v472_v45 = vld [vmem:[%s4628_s5 + $0x170] sm:$0xff]  ;;  %v541_v62 = vld [vmem:[%s4628_s5 + $0x398] sm:$0xff]  ;;  %v266_v63 = vld [vmem:[%s4630_s3] sm:$0xff]  ;;  %v2602_v0 = vpack.c.bf16 %v491_v55, %v490_v54 }
  0x2b   :  { %170 = vmatprep.mubr.f32.mxu0 %v2863_v4  ;;  %2477 = vmatprep.mubr.msk.f32.mxu1 %vm2864_vm0, %v2863_v4  ;;  %v435_v4 = vld [vmem:[%s4628_s5 + $0x48] sm:$0xff]  ;;  %v540_v61 = vld [vmem:[%s4628_s5 + $0x390] sm:$0xff]  ;;  %v525_v10 = vld [vmem:[%s4628_s5 + $0x318] sm:$0xff] }
  0x2c   :  { %171 = vmatmul.mubr.f32.gmra.mrb[4].mxu0 %v27_v56  ;;  %2478 = vmatmul.mubr.f32.gmra.mrb[4].mxu1 %v27_v56  ;;  %v2554_v16 = vpack.c.bf16 %v435_v4, %v434_v7  ;;  %v2632_v56 = vpack.c.bf16 %v539_v50, %v538_v49  ;;  %v492_v7 = vld [vmem:[%s4628_s5 + $0x210] sm:$0xff]  ;;  %v493_v4 = vld [vmem:[%s4628_s5 + $0x218] sm:$0xff]  ;;  %v510_v11 = vld [vmem:[%s4628_s5 + $0x2a0] sm:$0xff] }
  0x2d   :  { %2547 = vmatpush3.bf16.msra.mxu0 %v2546_v52  ;;  %2579 = vmatpush3.bf16.msra.mxu1 %v2578_v53  ;;  %v2598_v52 = vpack.c.bf16 %v473_v46, %v472_v45  ;;  %v2600_v53 = vpack.c.bf16 %v507_v48, %v506_v47  ;;  %v511_v12 = vld [vmem:[%s4628_s5 + $0x2a8] sm:$0xff]  ;;  %v289_v13 = vld [vmem:[%s4630_s3 + $0xb8] sm:$0xff]  ;;  %v542_v14 = vld [vmem:[%s4628_s5 + $0x3a0] sm:$0xff] }
  0x2e   :  { %2549 = vmatprep.subr.bf16.mxu0 %v2548_v57  ;;  %2581 = vmatprep.subr.bf16.mxu1 %v2580_v58  ;;  %v522_v57 = vld [vmem:[%s4628_s5 + $0x300] sm:$0xff]  ;;  %v523_v58 = vld [vmem:[%s4628_s5 + $0x308] sm:$0xff]  ;;  %v288_v18 = vld [vmem:[%s4630_s3 + $0xb0] sm:$0xff] }
  0x2f   :  { %858 = vmatprep.mubr.f32.mxu0 %v267_v1  ;;  %963 = vmatprep.mubr.f32.mxu1 %v269_v2  ;;  %v268_v1 = vld [vmem:[%s4630_s3 + $0x10] sm:$0xff]  ;;  %v287_v2 = vld [vmem:[%s4630_s3 + $0xa8] sm:$0xff]  ;;  %v494_v22 = vld [vmem:[%s4628_s5 + $0x220] sm:$0xff] }
  0x30   :  { %v543_v15 = vld [vmem:[%s4628_s5 + $0x3a8] sm:$0xff]  ;;  %v526_v24 = vld [vmem:[%s4628_s5 + $0x320] sm:$0xff]  ;;  %v512_v26 = vld [vmem:[%s4628_s5 + $0x2b0] sm:$0xff] }
  0x31   :  { %2551 = vmatpush3.bf16.msra.mxu0 %v2550_v5  ;;  %2583 = vmatpush3.bf16.msra.mxu1 %v2582_v6  ;;  %v2634_v5 = vpack.c.bf16 %v523_v58, %v522_v57  ;;  %v2604_v6 = vpack.c.bf16 %v509_v60, %v508_v59  ;;  %v307_v19 = vld [vmem:[%s4630_s3 + $0x148] sm:$0xff]  ;;  %v2640_v3 = vpack.c.bf16 %v543_v15, %v542_v14  ;;  %v544_v29 = vld [vmem:[%s4628_s5 + $0x3b0] sm:$0xff]  ;;  %v545_v30 = vld [vmem:[%s4628_s5 + $0x3b8] sm:$0xff] }
  0x32   :  { %2553 = vmatprep.subr.bf16.mxu0 %v2552_v8  ;;  %2585 = vmatprep.subr.bf16.mxu1 %v2584_v9  ;;  %v524_v8 = vld [vmem:[%s4628_s5 + $0x310] sm:$0xff]  ;;  %v2636_v9 = vpack.c.bf16 %v541_v62, %v540_v61  ;;  %v495_v23 = vld [vmem:[%s4628_s5 + $0x228] sm:$0xff]  ;;  %v497_v38 = vld [vmem:[%s4628_s5 + $0x238] sm:$0xff] }
  0x33   :  { %v527_v25 = vld [vmem:[%s4628_s5 + $0x328] sm:$0xff]  ;;  %v308_v33 = vld [vmem:[%s4630_s3 + $0x150] sm:$0xff]  ;;  %v529_v41 = vld [vmem:[%s4628_s5 + $0x338] sm:$0xff] }
  0x34   :  { %v327_v34 = vld [vmem:[%s4630_s3 + $0x1e8] sm:$0xff]  ;;  %v2642_v35 = vpack.c.bf16 %v527_v25, %v526_v24  ;;  %v496_v37 = vld [vmem:[%s4628_s5 + $0x230] sm:$0xff]  ;;  %v514_v42 = vld [vmem:[%s4628_s5 + $0x2c0] sm:$0xff] }
  0x35   :  { %2555 = vmatpush3.bf16.msra.mxu0 %v2554_v16  ;;  %2587 = vmatpush3.bf16.msra.mxu1 %v2586_v17  ;;  %v286_v16 = vld [vmem:[%s4630_s3 + $0xa0] sm:$0xff]  ;;  %v2606_v17 = vpack.c.bf16 %v493_v4, %v492_v7  ;;  %v547_v46 = vld [vmem:[%s4628_s5 + $0x3c8] sm:$0xff]  ;;  %v2614_v48 = vpack.c.bf16 %v497_v38, %v496_v37  ;;  %v328_v49 = vld [vmem:[%s4630_s3 + $0x1f0] sm:$0xff] }
  0x36   :  { %2557 = vmatprep.subr.bf16.mxu0 %v2556_v20  ;;  %2589 = vmatprep.subr.bf16.mxu1 %v2588_v21  ;;  %v2638_v20 = vpack.c.bf16 %v525_v10, %v524_v8  ;;  %v2608_v21 = vpack.c.bf16 %v511_v12, %v510_v11  ;;  %v546_v45 = vld [vmem:[%s4628_s5 + $0x3c0] sm:$0xff]  ;;  %v347_v50 = vld [vmem:[%s4630_s3 + $0x288] sm:$0xff]  ;;  %v516_v58 = vld [vmem:[%s4628_s5 + $0x2d0] sm:$0xff] }
  0x37   :  { %v326_v47 = vld [vmem:[%s4630_s3 + $0x1e0] sm:$0xff]  ;;  %v499_v54 = vld [vmem:[%s4628_s5 + $0x248] sm:$0xff]  ;;  %v517_v59 = vld [vmem:[%s4628_s5 + $0x2d8] sm:$0xff] }
  0x38   :  { %v530_v55 = vld [vmem:[%s4628_s5 + $0x340] sm:$0xff]  ;;  %v531_v57 = vld [vmem:[%s4628_s5 + $0x348] sm:$0xff]  ;;  %v349_v60 = vld [vmem:[%s4630_s3 + $0x298] sm:$0xff] }
  0x39   :  { %2559 = vmatpush3.bf16.msra.mxu0 %v2558_v27  ;;  %2591 = vmatpush3.bf16.msra.mxu1 %v2590_v28  ;;  %v513_v27 = vld [vmem:[%s4628_s5 + $0x2b8] sm:$0xff]  ;;  %v548_v61 = vld [vmem:[%s4628_s5 + $0x3d0] sm:$0xff]  ;;  %v518_v11 = vld [vmem:[%s4628_s5 + $0x2e0] sm:$0xff] }
  0x3a   :  { %2561 = vmatprep.subr.bf16.mxu0 %v2560_v31  ;;  %2593 = vmatprep.subr.bf16.mxu1 %v2592_v32  ;;  %v309_v28 = vld [vmem:[%s4630_s3 + $0x158] sm:$0xff]  ;;  %v306_v31 = vld [vmem:[%s4630_s3 + $0x140] sm:$0xff]  ;;  %v2610_v32 = vpack.c.bf16 %v495_v23, %v494_v22  ;;  %v2612_v36 = vpack.c.bf16 %v513_v27, %v512_v26  ;;  %v500_v7 = vld [vmem:[%s4628_s5 + $0x250] sm:$0xff] }
  0x3b   :  { %v549_v62 = vld [vmem:[%s4628_s5 + $0x3d8] sm:$0xff]  ;;  %v532_v8 = vld [vmem:[%s4628_s5 + $0x350] sm:$0xff]  ;;  %v519_v12 = vld [vmem:[%s4628_s5 + $0x2e8] sm:$0xff] }
  0x3c   :  { %v501_v4 = vld [vmem:[%s4628_s5 + $0x258] sm:$0xff]  ;;  %v550_v14 = vld [vmem:[%s4628_s5 + $0x3e0] sm:$0xff]  ;;  %v551_v15 = vld [vmem:[%s4628_s5 + $0x3e8] sm:$0xff] }
  0x3d   :  { %2563 = vmatpush3.bf16.msra.mxu0 %v2562_v39  ;;  %2595 = vmatpush3.bf16.msra.mxu1 %v2594_v40  ;;  %v528_v39 = vld [vmem:[%s4628_s5 + $0x330] sm:$0xff]  ;;  %v2644_v40 = vpack.c.bf16 %v545_v30, %v544_v29  ;;  %v533_v10 = vld [vmem:[%s4628_s5 + $0x358] sm:$0xff]  ;;  %v502_v22 = vld [vmem:[%s4628_s5 + $0x260] sm:$0xff] }
  0x3e   :  { %2565 = vmatprep.subr.bf16.mxu0 %v2564_v43  ;;  %2597 = vmatprep.subr.bf16.mxu1 %v2596_v44  ;;  %v515_v43 = vld [vmem:[%s4628_s5 + $0x2c8] sm:$0xff]  ;;  %v329_v44 = vld [vmem:[%s4630_s3 + $0x1f8] sm:$0xff]  ;;  %v534_v24 = vld [vmem:[%s4628_s5 + $0x360] sm:$0xff] }
  0x3f   :  { %v503_v23 = vld [vmem:[%s4628_s5 + $0x268] sm:$0xff]  ;;  %v520_v26 = vld [vmem:[%s4628_s5 + $0x2f0] sm:$0xff]  ;;  %v521_v27 = vld [vmem:[%s4628_s5 + $0x2f8] sm:$0xff] }
  0x40   :  { %v535_v25 = vld [vmem:[%s4628_s5 + $0x368] sm:$0xff]  ;;  %v552_v29 = vld [vmem:[%s4628_s5 + $0x3f0] sm:$0xff]  ;;  %v553_v30 = vld [vmem:[%s4628_s5 + $0x3f8] sm:$0xff] }
  0x41   :  { %2567 = vmatpush3.bf16.msra.mxu0 %v2566_v51  ;;  %2599 = vmatpush3.bf16.msra.mxu1 %v2598_v52  ;;  %v2646_v51 = vpack.c.bf16 %v529_v41, %v528_v39  ;;  %v2616_v52 = vpack.c.bf16 %v515_v43, %v514_v42  ;;  %v504_v37 = vld [vmem:[%s4628_s5 + $0x270] sm:$0xff]  ;;  %v505_v38 = vld [vmem:[%s4628_s5 + $0x278] sm:$0xff]  ;;  %v570_v42 = vld [vmem:[%s4628_s5 + $0x480] sm:$0xff] }
  0x42   :  { %2601 = vmatprep.subr.bf16.mxu0 %v2600_v53  ;;  %2633 = vmatprep.subr.bf16.mxu1 %v2632_v56  ;;  %v498_v53 = vld [vmem:[%s4628_s5 + $0x240] sm:$0xff]  ;;  %v2648_v56 = vpack.c.bf16 %v547_v46, %v546_v45  ;;  %v536_v39 = vld [vmem:[%s4628_s5 + $0x370] sm:$0xff]  ;;  %v537_v41 = vld [vmem:[%s4628_s5 + $0x378] sm:$0xff] }
  0x43   :  { %v571_v43 = vld [vmem:[%s4628_s5 + $0x488] sm:$0xff]  ;;  %v602_v45 = vld [vmem:[%s4628_s5 + $0x580] sm:$0xff] }
  0x44   :  { %859 = vmatmul.mubr.f32.vlgmr.msra.gmra.mrb[6].mxu0 %v266_v63  ;;  %964 = vmatmul.mubr.f32.vlgmr.msra.gmra.mrb[6].mxu1 %v268_v1  ;;  %v346_v63 = vld [vmem:[%s4630_s3 + $0x280] sm:$0xff]  ;;  %v348_v1 = vld [vmem:[%s4630_s3 + $0x290] sm:$0xff]  ;;  %v603_v46 = vld [vmem:[%s4628_s5 + $0x588] sm:$0xff] }
  0x45   :  { %2603 = vmatpush3.bf16.msra.mxu0 %v2602_v0  ;;  %863 = vmatprep.mubr.f32.mxu0 %v287_v2  ;;  %v2618_v0 = vpack.c.bf16 %v499_v54, %v498_v53  ;;  %v367_v2 = vld [vmem:[%s4630_s3 + $0x328] sm:$0xff]  ;;  %v554_v53 = vld [vmem:[%s4628_s5 + $0x400] sm:$0xff] }
  0x46   :  { %2635 = vmatpush3.bf16.msra.mxu1 %v2634_v5  ;;  %2605 = vmatprep.subr.bf16.mxu0 %v2604_v6  ;;  %v2650_v5 = vpack.c.bf16 %v531_v57, %v530_v55  ;;  %v2620_v6 = vpack.c.bf16 %v517_v59, %v516_v58  ;;  %v555_v54 = vld [vmem:[%s4628_s5 + $0x408] sm:$0xff]  ;;  %v270_v55 = vld [vmem:[%s4630_s3 + $0x20] sm:$0xff]  ;;  %v273_v59 = vld [vmem:[%s4630_s3 + $0x38] sm:$0xff] }
  0x47   :  { %968 = vmatprep.mubr.f32.mxu1 %v289_v13  ;;  %2637 = vmatprep.subr.bf16.mxu1 %v2636_v9  ;;  %v2652_v9 = vpack.c.bf16 %v549_v62, %v548_v61  ;;  %v369_v13 = vld [vmem:[%s4630_s3 + $0x338] sm:$0xff]  ;;  %v586_v57 = vld [vmem:[%s4628_s5 + $0x500] sm:$0xff]  ;;  %v587_v58 = vld [vmem:[%s4628_s5 + $0x508] sm:$0xff]  ;;  %v2666_v62 = vpack.c.bf16 %v555_v54, %v554_v53 }
  0x48   :  { %864 = vmatmul.mubr.f32.gmra.mrb[8].mxu0 %v286_v16  ;;  %969 = vmatmul.mubr.f32.gmra.mrb[8].mxu1 %v288_v18  ;;  %v366_v16 = vld [vmem:[%s4630_s3 + $0x320] sm:$0xff]  ;;  %v368_v18 = vld [vmem:[%s4630_s3 + $0x330] sm:$0xff]  ;;  %v573_v61 = vld [vmem:[%s4628_s5 + $0x498] sm:$0xff] }
  0x49   :  { %2607 = vmatpush3.bf16.msra.mxu0 %v2606_v17  ;;  %868 = vmatprep.mubr.f32.mxu0 %v307_v19  ;;  %v2622_v17 = vpack.c.bf16 %v501_v4, %v500_v7  ;;  %v387_v19 = vld [vmem:[%s4630_s3 + $0x3c8] sm:$0xff]  ;;  %v557_v7 = vld [vmem:[%s4628_s5 + $0x418] sm:$0xff]  ;;  %v562_v53 = vld [vmem:[%s4628_s5 + $0x440] sm:$0xff] }
  0x4a   :  { %2639 = vmatpush3.bf16.msra.mxu1 %v2638_v20  ;;  %2609 = vmatprep.subr.bf16.mxu0 %v2608_v21  ;;  %v2654_v20 = vpack.c.bf16 %v533_v10, %v532_v8  ;;  %v2624_v21 = vpack.c.bf16 %v519_v12, %v518_v11  ;;  %v291_v4 = vld [vmem:[%s4630_s3 + $0xc8] sm:$0xff]  ;;  %v589_v10 = vld [vmem:[%s4628_s5 + $0x518] sm:$0xff] }
  0x4b   :  { %973 = vmatprep.mubr.f32.mxu1 %v309_v28  ;;  %2641 = vmatprep.subr.bf16.mxu1 %v2640_v3  ;;  %v2656_v3 = vpack.c.bf16 %v551_v15, %v550_v14  ;;  %v389_v28 = vld [vmem:[%s4630_s3 + $0x3d8] sm:$0xff]  ;;  %v575_v14 = vld [vmem:[%s4628_s5 + $0x4a8] sm:$0xff]  ;;  %v290_v15 = vld [vmem:[%s4630_s3 + $0xc0] sm:$0xff] }
  0x4c   :  { %869 = vmatmul.mubr.f32.gmra.mrb[10].mxu0 %v306_v31  ;;  %974 = vmatmul.mubr.f32.gmra.mrb[10].mxu1 %v308_v33  ;;  %v386_v31 = vld [vmem:[%s4630_s3 + $0x3c0] sm:$0xff]  ;;  %v388_v33 = vld [vmem:[%s4630_s3 + $0x3d0] sm:$0xff]  ;;  %v293_v11 = vld [vmem:[%s4630_s3 + $0xd8] sm:$0xff] }
  0x4d   :  { %2611 = vmatpush3.bf16.msra.mxu0 %v2610_v32  ;;  %873 = vmatprep.mubr.f32.mxu0 %v327_v34  ;;  %v2626_v32 = vpack.c.bf16 %v503_v23, %v502_v22  ;;  %v407_v34 = vld [vmem:[%s4630_s3 + $0x468] sm:$0xff] }
  0x4e   :  { %2643 = vmatpush3.bf16.msra.mxu1 %v2642_v35  ;;  %2613 = vmatprep.subr.bf16.mxu0 %v2612_v36  ;;  %v2658_v35 = vpack.c.bf16 %v535_v25, %v534_v24  ;;  %v2628_v36 = vpack.c.bf16 %v521_v27, %v520_v26  ;;  %v559_v22 = vld [vmem:[%s4628_s5 + $0x428] sm:$0xff]  ;;  %v606_v24 = vld [vmem:[%s4628_s5 + $0x5a0] sm:$0xff]  ;;  %v576_v27 = vld [vmem:[%s4628_s5 + $0x4b0] sm:$0xff] }
  0x4f   :  { %978 = vmatprep.mubr.f32.mxu1 %v329_v44  ;;  %2645 = vmatprep.subr.bf16.mxu1 %v2644_v40  ;;  %v2660_v40 = vpack.c.bf16 %v553_v30, %v552_v29  ;;  %v409_v44 = vld [vmem:[%s4630_s3 + $0x478] sm:$0xff]  ;;  %v590_v25 = vld [vmem:[%s4628_s5 + $0x520] sm:$0xff]  ;;  %v591_v26 = vld [vmem:[%s4628_s5 + $0x528] sm:$0xff] }
  0x50   :  { %874 = vmatmul.mubr.f32.gmra.mrb[12].mxu0 %v326_v47  ;;  %979 = vmatmul.mubr.f32.gmra.mrb[12].mxu1 %v328_v49  ;;  %v406_v47 = vld [vmem:[%s4630_s3 + $0x460] sm:$0xff]  ;;  %v408_v49 = vld [vmem:[%s4630_s3 + $0x470] sm:$0xff]  ;;  %v313_v30 = vld [vmem:[%s4630_s3 + $0x178] sm:$0xff] }
  0x51   :  { %2615 = vmatpush3.bf16.msra.mxu0 %v2614_v48  ;;  %878 = vmatprep.mubr.f32.mxu0 %v347_v50  ;;  %v2630_v48 = vpack.c.bf16 %v505_v38, %v504_v37  ;;  %v271_v50 = vld [vmem:[%s4630_s3 + $0x28] sm:$0xff]  ;;  %v310_v29 = vld [vmem:[%s4630_s3 + $0x160] sm:$0xff]  ;;  %v2706_v37 = vpack.c.bf16 %v591_v26, %v590_v25 }
  0x52   :  { %2647 = vmatpush3.bf16.msra.mxu1 %v2646_v51  ;;  %2617 = vmatprep.subr.bf16.mxu0 %v2616_v52  ;;  %v2662_v51 = vpack.c.bf16 %v537_v41, %v536_v39  ;;  %v2664_v52 = vpack.c.bf16 %v571_v43, %v570_v42  ;;  %v608_v39 = vld [vmem:[%s4628_s5 + $0x5b0] sm:$0xff]  ;;  %v330_v41 = vld [vmem:[%s4630_s3 + $0x200] sm:$0xff]  ;;  %v593_v43 = vld [vmem:[%s4628_s5 + $0x538] sm:$0xff] }
  0x53   :  { %983 = vmatprep.mubr.f32.mxu1 %v349_v60  ;;  %2649 = vmatprep.subr.bf16.mxu1 %v2648_v56  ;;  %v2696_v56 = vpack.c.bf16 %v603_v46, %v602_v45  ;;  %v572_v60 = vld [vmem:[%s4628_s5 + $0x490] sm:$0xff]  ;;  %v578_v46 = vld [vmem:[%s4628_s5 + $0x4c0] sm:$0xff]  ;;  %v563_v54 = vld [vmem:[%s4628_s5 + $0x448] sm:$0xff] }
  0x54   :  { %879 = vmatmul.mubr.f32.gmra.mrb[14].mxu0 %v346_v63  ;;  %984 = vmatmul.mubr.f32.gmra.mrb[14].mxu1 %v348_v1  ;;  %v746_v63 = vld [vmem:[%s4631_s4] sm:$0xff]  ;;  %v605_v1 = vld [vmem:[%s4628_s5 + $0x598] sm:$0xff]  ;;  %v2668_v8 = vpack.c.bf16 %v573_v61, %v572_v60  ;;  %v592_v42 = vld [vmem:[%s4628_s5 + $0x530] sm:$0xff] }
  0x55   :  { %2619 = vmatpush3.bf16.msra.mxu0 %v2618_v0  ;;  %883 = vmatprep.mubr.f32.mxu0 %v367_v2  ;;  %v604_v0 = vld [vmem:[%s4628_s5 + $0x590] sm:$0xff]  ;;  %v594_v60 = vld [vmem:[%s4628_s5 + $0x540] sm:$0xff]  ;;  %v595_v61 = vld [vmem:[%s4628_s5 + $0x548] sm:$0xff] }
  0x56   :  { %2651 = vmatpush3.bf16.msra.mxu1 %v2650_v5  ;;  %2621 = vmatprep.subr.bf16.mxu0 %v2620_v6  ;;  %v272_v2 = vld [vmem:[%s4630_s3 + $0x30] sm:$0xff]  ;;  %v2698_v5 = vpack.c.bf16 %v587_v58, %v586_v57  ;;  %v2700_v12 = vpack.c.bf16 %v605_v1, %v604_v0  ;;  %v610_v57 = vld [vmem:[%s4628_s5 + $0x5c0] sm:$0xff]  ;;  %v611_v58 = vld [vmem:[%s4628_s5 + $0x5c8] sm:$0xff] }
  0x57   :  { %988 = vmatprep.mubr.f32.mxu1 %v369_v13  ;;  %2653 = vmatprep.subr.bf16.mxu1 %v2652_v9  ;;  %v556_v6 = vld [vmem:[%s4628_s5 + $0x410] sm:$0xff]  ;;  %v574_v13 = vld [vmem:[%s4628_s5 + $0x4a0] sm:$0xff]  ;;  %v581_v1 = vld [vmem:[%s4628_s5 + $0x4d8] sm:$0xff] }
  0x58   :  { %884 = vmatmul.mubr.f32.gmra.mrb[16].mxu0 %v366_v16  ;;  %989 = vmatmul.mubr.f32.gmra.mrb[16].mxu1 %v368_v18  ;;  %v588_v9 = vld [vmem:[%s4628_s5 + $0x510] sm:$0xff]  ;;  %v2670_v16 = vpack.c.bf16 %v557_v7, %v556_v6  ;;  %v311_v18 = vld [vmem:[%s4630_s3 + $0x168] sm:$0xff]  ;;  %v2672_v23 = vpack.c.bf16 %v575_v14, %v574_v13  ;;  %v565_v7 = vld [vmem:[%s4628_s5 + $0x458] sm:$0xff] }
  0x59   :  { %2623 = vmatpush3.bf16.msra.mxu0 %v2622_v17  ;;  %888 = vmatprep.mubr.f32.mxu0 %v387_v19  ;;  %v292_v17 = vld [vmem:[%s4630_s3 + $0xd0] sm:$0xff]  ;;  %v2702_v19 = vpack.c.bf16 %v589_v10, %v588_v9  ;;  %v613_v10 = vld [vmem:[%s4628_s5 + $0x5d8] sm:$0xff]  ;;  %v615_v25 = vld [vmem:[%s4628_s5 + $0x5e8] sm:$0xff] }
  0x5a   :  { %2655 = vmatpush3.bf16.msra.mxu1 %v2654_v20  ;;  %2625 = vmatprep.subr.bf16.mxu0 %v2624_v21  ;;  %v747_v20 = vld [vmem:[%s4631_s4 + $0x8] sm:$0xff]  ;;  %v558_v21 = vld [vmem:[%s4628_s5 + $0x420] sm:$0xff]  ;;  %v580_v0 = vld [vmem:[%s4628_s5 + $0x4d0] sm:$0xff] }
  0x5b   :  { %993 = vmatprep.mubr.f32.mxu1 %v389_v28  ;;  %2657 = vmatprep.subr.bf16.mxu1 %v2656_v3  ;;  %v607_v3 = vld [vmem:[%s4628_s5 + $0x5a8] sm:$0xff]  ;;  %v577_v28 = vld [vmem:[%s4628_s5 + $0x4b8] sm:$0xff]  ;;  %v564_v6 = vld [vmem:[%s4628_s5 + $0x450] sm:$0xff] }
  0x5c   :  { %889 = vmatmul.mubr.f32.gmra.mrb[18].mxu0 %v386_v31  ;;  %994 = vmatmul.mubr.f32.gmra.mrb[18].mxu1 %v388_v33  ;;  %v2674_v31 = vpack.c.bf16 %v559_v22, %v558_v21  ;;  %v2704_v33 = vpack.c.bf16 %v607_v3, %v606_v24  ;;  %v2676_v38 = vpack.c.bf16 %v577_v28, %v576_v27  ;;  %v612_v9 = vld [vmem:[%s4628_s5 + $0x5d0] sm:$0xff]  ;;  %v597_v14 = vld [vmem:[%s4628_s5 + $0x558] sm:$0xff]  ;;  %v566_v21 = vld [vmem:[%s4628_s5 + $0x460] sm:$0xff] }
  0x5d   :  { %2627 = vmatpush3.bf16.msra.mxu0 %v2626_v32  ;;  %893 = vmatprep.mubr.f32.mxu0 %v407_v34  ;;  %v312_v32 = vld [vmem:[%s4630_s3 + $0x170] sm:$0xff]  ;;  %v567_v22 = vld [vmem:[%s4628_s5 + $0x468] sm:$0xff]  ;;  %v614_v3 = vld [vmem:[%s4628_s5 + $0x5e0] sm:$0xff] }
  0x5e   :  { %2659 = vmatpush3.bf16.msra.mxu1 %v2658_v35  ;;  %2629 = vmatprep.subr.bf16.mxu0 %v2628_v36  ;;  %v560_v34 = vld [vmem:[%s4628_s5 + $0x430] sm:$0xff]  ;;  %v561_v35 = vld [vmem:[%s4628_s5 + $0x438] sm:$0xff]  ;;  %v331_v36 = vld [vmem:[%s4630_s3 + $0x208] sm:$0xff] }
  0x5f   :  { %998 = vmatprep.mubr.f32.mxu1 %v409_v44  ;;  %2661 = vmatprep.subr.bf16.mxu1 %v2660_v40  ;;  %v609_v40 = vld [vmem:[%s4628_s5 + $0x5b8] sm:$0xff]  ;;  %v750_v44 = vld [vmem:[%s4631_s4 + $0x20] sm:$0xff]  ;;  %v2678_v45 = vpack.c.bf16 %v561_v35, %v560_v34  ;;  %v596_v13 = vld [vmem:[%s4628_s5 + $0x550] sm:$0xff] }
  0x60   :  { %894 = vmatmul.mubr.f32.gmra.mrb[20].mxu0 %v406_v47  ;;  %999 = vmatmul.mubr.f32.gmra.mrb[20].mxu1 %v408_v49  ;;  %v579_v47 = vld [vmem:[%s4628_s5 + $0x4c8] sm:$0xff]  ;;  %v332_v49 = vld [vmem:[%s4630_s3 + $0x210] sm:$0xff]  ;;  %v2718_v24 = vpack.c.bf16 %v597_v14, %v596_v13  ;;  %v598_v28 = vld [vmem:[%s4628_s5 + $0x560] sm:$0xff] }
  0x61   :  { %2631 = vmatpush3.bf16.msra.mxu0 %v2630_v48  ;;  %1068 = vmatprep.mubr.f32.mxu0 %v271_v50  ;;  %v333_v48 = vld [vmem:[%s4630_s3 + $0x218] sm:$0xff]  ;;  %v2708_v50 = vpack.c.bf16 %v609_v40, %v608_v39  ;;  %v391_v26 = vld [vmem:[%s4630_s3 + $0x3e8] sm:$0xff]  ;;  %v392_v35 = vld [vmem:[%s4630_s3 + $0x3f0] sm:$0xff] }
  0x62   :  { %2663 = vmatpush3.bf16.msra.mxu1 %v2662_v51  ;;  %2665 = vmatprep.subr.bf16.mxu0 %v2664_v52  ;;  %v351_v51 = vld [vmem:[%s4630_s3 + $0x2a8] sm:$0xff]  ;;  %v2710_v52 = vpack.c.bf16 %v593_v43, %v592_v42  ;;  %v393_v34 = vld [vmem:[%s4630_s3 + $0x3f8] sm:$0xff]  ;;  %v410_v39 = vld [vmem:[%s4630_s3 + $0x480] sm:$0xff] }
  0x63   :  { %1173 = vmatprep.mubr.f32.mxu1 %v273_v59  ;;  %2697 = vmatprep.subr.bf16.mxu1 %v2696_v56  ;;  %v2680_v56 = vpack.c.bf16 %v579_v47, %v578_v46  ;;  %v752_v59 = vld [vmem:[%s4631_s4 + $0x30] sm:$0xff]  ;;  %v601_v46 = vld [vmem:[%s4628_s5 + $0x578] sm:$0xff]  ;;  %v634_v47 = vld [vmem:[%s4628_s5 + $0x680] sm:$0xff] }
  0x64   :  { %1069 = vmatmul.mubr.f32.vlgmr.msra.gmra.mrb[22].mxu0 %v270_v55  ;;  %756 = vperm.xlu0 %2860, %v746_v63   ;;  %v350_v55 = vld [vmem:[%s4630_s3 + $0x2a0] sm:$0xff]  ;;  %v2682_v63 = vpack.c.bf16 %v563_v54, %v562_v53  ;;  %v568_v40 = vld [vmem:[%s4628_s5 + $0x470] sm:$0xff] }
  0x65   :  { %2667 = vmatpush3.bf16.msra.mxu0 %v2666_v62  ;;  %1174 = vmatmul.mubr.f32.vlgmr.msra.gmra.mrb[22].mxu1 %v272_v2  ;;  %v353_v62 = vld [vmem:[%s4630_s3 + $0x2b8] sm:$0xff]  ;;  %v352_v2 = vld [vmem:[%s4630_s3 + $0x2b0] sm:$0xff]  ;;  %v618_v54 = vld [vmem:[%s4628_s5 + $0x600] sm:$0xff] }
  0x66   :  { %1073 = vmatprep.mubr.f32.mxu0 %v291_v4  ;;  %2699 = vmatpush3.bf16.msra.mxu1 %v2698_v5  ;;  %v2712_v5 = vpack.c.bf16 %v611_v58, %v610_v57  ;;  %v371_v4 = vld [vmem:[%s4630_s3 + $0x348] sm:$0xff]  ;;  %v616_v43 = vld [vmem:[%s4628_s5 + $0x5f0] sm:$0xff] }
  0x67   :  { %2669 = vmatprep.subr.bf16.mxu0 %v2668_v8  ;;  %1178 = vmatprep.mubr.f32.mxu1 %v293_v11  ;;  %v2714_v8 = vpack.c.bf16 %v595_v61, %v594_v60  ;;  %v370_v11 = vld [vmem:[%s4630_s3 + $0x340] sm:$0xff]  ;;  %v667_v60 = vld [vmem:[%s4628_s5 + $0x788] sm:$0xff]  ;;  %v668_v14 = vld [vmem:[%s4628_s5 + $0x790] sm:$0xff] }
  0x68   :  { %1074 = vmatmul.mubr.f32.gmra.mrb[24].mxu0 %v290_v15  ;;  %2701 = vmatprep.subr.bf16.mxu1 %v2700_v12  ;;  %v2684_v12 = vpack.c.bf16 %v581_v1, %v580_v0  ;;  %v76_v15 = vld [vmem:[%s4632_s1] sm:$0xff]  ;;  %v749_v0 = vld [vmem:[%s4631_s4 + $0x18] sm:$0xff] }
  0x69   :  { %2671 = vmatpush3.bf16.msra.mxu0 %v2670_v16  ;;  %1179 = vmatmul.mubr.f32.gmra.mrb[24].mxu1 %v292_v17  ;;  %v2686_v16 = vpack.c.bf16 %v565_v7, %v564_v6  ;;  %v582_v17 = vld [vmem:[%s4628_s5 + $0x4e0] sm:$0xff]  ;;  %v277_v6 = vld [vmem:[%s4630_s3 + $0x58] sm:$0xff]  ;;  %v276_v7 = vld [vmem:[%s4630_s3 + $0x50] sm:$0xff] }
  0x6a   :  { %1078 = vmatprep.mubr.f32.mxu0 %v311_v18  ;;  %2703 = vmatpush3.bf16.msra.mxu1 %v2702_v19  ;;  %v583_v18 = vld [vmem:[%s4628_s5 + $0x4e8] sm:$0xff]  ;;  %v373_v19 = vld [vmem:[%s4630_s3 + $0x358] sm:$0xff]  ;;  %v274_v61 = vld [vmem:[%s4630_s3 + $0x40] sm:$0xff] }
  0x6b   :  { %2673 = vmatprep.subr.bf16.mxu0 %v2672_v23  ;;  %761 = vperm.xlu0 %2860, %v747_v20   ;;  %v2716_v20 = vpack.c.bf16 %v613_v10, %v612_v9  ;;  %v372_v23 = vld [vmem:[%s4630_s3 + $0x350] sm:$0xff]  ;;  %v2688_v27 = vpack.c.bf16 %v583_v18, %v582_v17  ;;  %v653_v18 = vld [vmem:[%s4628_s5 + $0x718] sm:$0xff] }
  0x6c   :  { %1079 = vmatmul.mubr.f32.gmra.mrb[26].mxu0 %v310_v29  ;;  %1183 = vmatprep.mubr.f32.mxu1 %v313_v30  ;;  %v599_v29 = vld [vmem:[%s4628_s5 + $0x568] sm:$0xff]  ;;  %v390_v30 = vld [vmem:[%s4630_s3 + $0x3e0] sm:$0xff]  ;;  %v620_v10 = vld [vmem:[%s4628_s5 + $0x610] sm:$0xff] }
  0x6d   :  { %2675 = vmatpush3.bf16.msra.mxu0 %v2674_v31  ;;  %1184 = vmatmul.mubr.f32.gmra.mrb[26].mxu1 %v312_v32  ;;  %v2690_v31 = vpack.c.bf16 %v567_v22, %v566_v21  ;;  %v584_v32 = vld [vmem:[%s4628_s5 + $0x4f0] sm:$0xff]  ;;  %v638_v21 = vld [vmem:[%s4628_s5 + $0x6a0] sm:$0xff]  ;;  %v639_v22 = vld [vmem:[%s4628_s5 + $0x6a8] sm:$0xff] }
  0x6e   :  { %2705 = vmatprep.subr.bf16.mxu1 %v2704_v33  ;;  %1083 = vmatprep.mubr.f32.mxu0 %v331_v36  ;;  %v585_v33 = vld [vmem:[%s4628_s5 + $0x4f8] sm:$0xff]  ;;  %v2720_v36 = vpack.c.bf16 %v615_v25, %v614_v3  ;;  %v652_v17 = vld [vmem:[%s4628_s5 + $0x710] sm:$0xff]  ;;  %v622_v3 = vld [vmem:[%s4628_s5 + $0x620] sm:$0xff] }
  0x6f   :  { %2707 = vmatpush3.bf16.msra.mxu1 %v2706_v37  ;;  %2677 = vmatprep.subr.bf16.mxu0 %v2676_v38  ;;  %v411_v37 = vld [vmem:[%s4630_s3 + $0x488] sm:$0xff]  ;;  %v2722_v38 = vpack.c.bf16 %v599_v29, %v598_v28  ;;  %v2692_v42 = vpack.c.bf16 %v585_v33, %v584_v32  ;;  %v670_v28 = vld [vmem:[%s4628_s5 + $0x7a0] sm:$0xff] }
  0x70   :  { %1084 = vmatmul.mubr.f32.gmra.mrb[28].mxu0 %v330_v41  ;;  %776 = vperm.xlu0 %2860, %v750_v44   ;;  %v569_v41 = vld [vmem:[%s4628_s5 + $0x478] sm:$0xff]  ;;  %v623_v25 = vld [vmem:[%s4628_s5 + $0x628] sm:$0xff]  ;;  %v654_v32 = vld [vmem:[%s4628_s5 + $0x720] sm:$0xff] }
  0x71   :  { %1188 = vmatprep.mubr.f32.mxu1 %v333_v48  ;;  %2679 = vmatpush3.bf16.msra.mxu0 %v2678_v45  ;;  %v617_v44 = vld [vmem:[%s4628_s5 + $0x5f8] sm:$0xff]  ;;  %v600_v45 = vld [vmem:[%s4628_s5 + $0x570] sm:$0xff]  ;;  %v635_v48 = vld [vmem:[%s4628_s5 + $0x688] sm:$0xff] }
  0x72   :  { %1189 = vmatmul.mubr.f32.gmra.mrb[28].mxu1 %v332_v49  ;;  %2709 = vmatprep.subr.bf16.mxu1 %v2708_v50  ;;  %v748_v49 = vld [vmem:[%s4631_s4 + $0x10] sm:$0xff]  ;;  %v413_v50 = vld [vmem:[%s4630_s3 + $0x498] sm:$0xff]  ;;  %v2724_v53 = vpack.c.bf16 %v617_v44, %v616_v43  ;;  %v2726_v57 = vpack.c.bf16 %v601_v46, %v600_v45  ;;  %v2728_v58 = vpack.c.bf16 %v635_v48, %v634_v47  ;;  %v671_v29 = vld [vmem:[%s4628_s5 + $0x7a8] sm:$0xff] }
  0x73   :  { %1088 = vmatprep.mubr.f32.mxu0 %v351_v51  ;;  %2711 = vmatpush3.bf16.msra.mxu1 %v2710_v52  ;;  %v2694_v51 = vpack.c.bf16 %v569_v41, %v568_v40  ;;  %v412_v52 = vld [vmem:[%s4630_s3 + $0x490] sm:$0xff]  ;;  %v655_v33 = vld [vmem:[%s4628_s5 + $0x728] sm:$0xff]  ;;  %v2768_v40 = vpack.c.bf16 %v671_v29, %v670_v28  ;;  %v625_v44 = vld [vmem:[%s4628_s5 + $0x638] sm:$0xff] }
  0x74   :  { %1089 = vmatmul.mubr.f32.gmra.mrb[30].mxu0 %v350_v55  ;;  %2681 = vmatprep.subr.bf16.mxu0 %v2680_v56  ;;  %v619_v55 = vld [vmem:[%s4628_s5 + $0x608] sm:$0xff]  ;;  %v624_v43 = vld [vmem:[%s4628_s5 + $0x630] sm:$0xff]  ;;  %v334_v45 = vld [vmem:[%s4630_s3 + $0x220] sm:$0xff] }
  0x75   :  { %786 = vperm.xlu0 %2860, %v752_v59   ;;  %1193 = vmatprep.mubr.f32.mxu1 %v353_v62  ;;  %v275_v56 = vld [vmem:[%s4630_s3 + $0x48] sm:$0xff]  ;;  %v666_v59 = vld [vmem:[%s4628_s5 + $0x780] sm:$0xff]  ;;  %v2730_v1 = vpack.c.bf16 %v619_v55, %v618_v54  ;;  %v672_v47 = vld [vmem:[%s4628_s5 + $0x7b0] sm:$0xff] }
  0x76   :  { %2683 = vmatpush3.bf16.msra.mxu0 %v2682_v63  ;;  %1194 = vmatmul.mubr.f32.gmra.mrb[30].mxu1 %v352_v2  ;;  %v650_v62 = vld [vmem:[%s4628_s5 + $0x700] sm:$0xff]  ;;  %v651_v63 = vld [vmem:[%s4628_s5 + $0x708] sm:$0xff]  ;;  %v636_v2 = vld [vmem:[%s4628_s5 + $0x690] sm:$0xff] }
  0x77   :  { %2713 = vmatprep.subr.bf16.mxu1 %v2712_v5  ;;  %1093 = vmatprep.mubr.f32.mxu0 %v371_v4  ;;  %v637_v5 = vld [vmem:[%s4628_s5 + $0x698] sm:$0xff]  ;;  %v2760_v4 = vpack.c.bf16 %v667_v60, %v666_v59  ;;  %v2762_v9 = vpack.c.bf16 %v651_v63, %v650_v62  ;;  %v335_v41 = vld [vmem:[%s4630_s3 + $0x228] sm:$0xff]  ;;  %v642_v54 = vld [vmem:[%s4628_s5 + $0x6c0] sm:$0xff] }
  0x78   :  { %2715 = vmatpush3.bf16.msra.mxu1 %v2714_v8  ;;  %1094 = vmatmul.mubr.f32.gmra.mrb[32].mxu0 %v370_v11  ;;  %v295_v8 = vld [vmem:[%s4630_s3 + $0xe8] sm:$0xff]  ;;  %v621_v11 = vld [vmem:[%s4628_s5 + $0x618] sm:$0xff]  ;;  %v2732_v13 = vpack.c.bf16 %v637_v5, %v636_v2  ;;  %v674_v62 = vld [vmem:[%s4628_s5 + $0x7c0] sm:$0xff] }
  0x79   :  { %2685 = vmatprep.subr.bf16.mxu0 %v2684_v12  ;;  %81 = vperm.xlu0 %2860, %v76_v15   ;;  %v294_v12 = vld [vmem:[%s4630_s3 + $0xe0] sm:$0xff]  ;;  %v669_v15 = vld [vmem:[%s4628_s5 + $0x798] sm:$0xff]  ;;  %v643_v55 = vld [vmem:[%s4628_s5 + $0x6c8] sm:$0xff] }
  0x7a   :  { %1198 = vmatprep.mubr.f32.mxu1 %v373_v19  ;;  %2687 = vmatpush3.bf16.msra.mxu0 %v2686_v16  ;;  %v751_v16 = vld [vmem:[%s4631_s4 + $0x28] sm:$0xff]  ;;  %v297_v19 = vld [vmem:[%s4630_s3 + $0xf8] sm:$0xff]  ;;  %v658_v2 = vld [vmem:[%s4628_s5 + $0x740] sm:$0xff] }
  0x7b   :  { %1199 = vmatmul.mubr.f32.gmra.mrb[32].mxu1 %v372_v23  ;;  %2717 = vmatprep.subr.bf16.mxu1 %v2716_v20  ;;  %v2734_v20 = vpack.c.bf16 %v621_v11, %v620_v10  ;;  %v296_v23 = vld [vmem:[%s4630_s3 + $0xf0] sm:$0xff]  ;;  %v673_v48 = vld [vmem:[%s4628_s5 + $0x7b8] sm:$0xff]  ;;  %v627_v59 = vld [vmem:[%s4628_s5 + $0x648] sm:$0xff] }
  0x7c   :  { %1098 = vmatprep.mubr.f32.mxu0 %v391_v26  ;;  %2719 = vmatpush3.bf16.msra.mxu1 %v2718_v24  ;;  %v2764_v24 = vpack.c.bf16 %v669_v15, %v668_v14  ;;  %v315_v26 = vld [vmem:[%s4630_s3 + $0x188] sm:$0xff]  ;;  %v628_v11 = vld [vmem:[%s4628_s5 + $0x650] sm:$0xff] }
  0x7d   :  { %1099 = vmatmul.mubr.f32.gmra.mrb[34].mxu0 %v390_v30  ;;  %2689 = vmatprep.subr.bf16.mxu0 %v2688_v27  ;;  %v2766_v27 = vpack.c.bf16 %v653_v18, %v652_v17  ;;  %v314_v30 = vld [vmem:[%s4630_s3 + $0x180] sm:$0xff]  ;;  %v355_v60 = vld [vmem:[%s4630_s3 + $0x2c8] sm:$0xff]  ;;  %v676_v15 = vld [vmem:[%s4628_s5 + $0x7d0] sm:$0xff] }
  0x7e   :  { %1203 = vmatprep.mubr.f32.mxu1 %v393_v34  ;;  %2691 = vmatpush3.bf16.msra.mxu0 %v2690_v31  ;;  %v2736_v31 = vpack.c.bf16 %v639_v22, %v638_v21  ;;  %v753_v34 = vld [vmem:[%s4631_s4 + $0x38] sm:$0xff]  ;;  %v675_v63 = vld [vmem:[%s4628_s5 + $0x7c8] sm:$0xff]  ;;  %v374_v21 = vld [vmem:[%s4630_s3 + $0x360] sm:$0xff] }
  0x7f   :  { %1204 = vmatmul.mubr.f32.gmra.mrb[34].mxu1 %v392_v35  ;;  %2721 = vmatprep.subr.bf16.mxu1 %v2720_v36  ;;  %v2738_v35 = vpack.c.bf16 %v623_v25, %v622_v3  ;;  %v640_v36 = vld [vmem:[%s4628_s5 + $0x6b0] sm:$0xff]  ;;  %v659_v5 = vld [vmem:[%s4628_s5 + $0x748] sm:$0xff]  ;;  %v2776_v10 = vpack.c.bf16 %v675_v63, %v674_v62  ;;  %v377_v3 = vld [vmem:[%s4630_s3 + $0x378] sm:$0xff] }
  0x80   :  { %1103 = vmatprep.mubr.f32.mxu0 %v411_v37  ;;  %2723 = vmatpush3.bf16.msra.mxu1 %v2722_v38  ;;  %v641_v37 = vld [vmem:[%s4628_s5 + $0x6b8] sm:$0xff]  ;;  %v2778_v14 = vpack.c.bf16 %v659_v5, %v658_v2  ;;  %v375_v17 = vld [vmem:[%s4630_s3 + $0x368] sm:$0xff]  ;;  %v376_v28 = vld [vmem:[%s4630_s3 + $0x370] sm:$0xff] }
  0x81   :  { %1104 = vmatmul.mubr.f32.gmra.mrb[36].mxu0 %v410_v39  ;;  %2693 = vmatprep.subr.bf16.mxu0 %v2692_v42  ;;  %v317_v38 = vld [vmem:[%s4630_s3 + $0x198] sm:$0xff]  ;;  %v316_v39 = vld [vmem:[%s4630_s3 + $0x190] sm:$0xff]  ;;  %v2770_v42 = vpack.c.bf16 %v655_v33, %v654_v32  ;;  %v2740_v46 = vpack.c.bf16 %v641_v37, %v640_v36  ;;  %v395_v32 = vld [vmem:[%s4630_s3 + $0x408] sm:$0xff] }
  0x82   :  { %766 = vperm.xlu1 %2861, %v748_v49   ;;  %1208 = vmatprep.mubr.f32.mxu1 %v413_v50  ;;  %v77_v49 = vld [vmem:[%s4632_s1 + $0x8] sm:$0xff]  ;;  %v656_v50 = vld [vmem:[%s4628_s5 + $0x730] sm:$0xff]  ;;  %v394_v36 = vld [vmem:[%s4630_s3 + $0x400] sm:$0xff] }
  0x83   :  { %2695 = vmatpush3.bf16.msra.mxu0 %v2694_v51  ;;  %1209 = vmatmul.mubr.f32.gmra.mrb[36].mxu1 %v412_v52  ;;  %v657_v51 = vld [vmem:[%s4628_s5 + $0x738] sm:$0xff]  ;;  %v730_v62 = vld [vmem:[%s4628_s5 + $0x980] sm:$0xff]  ;;  %v731_v63 = vld [vmem:[%s4628_s5 + $0x988] sm:$0xff] }
  0x84   :  { %2725 = vmatprep.subr.bf16.mxu1 %v2724_v53  ;;  %1278 = vmatprep.mubr.f32.mxu0 %v275_v56  ;;  %v337_v52 = vld [vmem:[%s4630_s3 + $0x238] sm:$0xff]  ;;  %v2742_v53 = vpack.c.bf16 %v625_v44, %v624_v43  ;;  %v336_v56 = vld [vmem:[%s4630_s3 + $0x230] sm:$0xff]  ;;  %v714_v2 = vld [vmem:[%s4628_s5 + $0x900] sm:$0xff] }
  0x85   :  { %2727 = vmatpush3.bf16.msra.mxu1 %v2726_v57  ;;  %2729 = vmatprep.subr.bf16.mxu0 %v2728_v58  ;;  %v2772_v57 = vpack.c.bf16 %v673_v48, %v672_v47  ;;  %v626_v58 = vld [vmem:[%s4628_s5 + $0x640] sm:$0xff]  ;;  %v633_v43 = vld [vmem:[%s4628_s5 + $0x678] sm:$0xff]  ;;  %v396_v44 = vld [vmem:[%s4630_s3 + $0x410] sm:$0xff] }
  0x86   :  { %1279 = vmatmul.mubr.f32.vlgmr.msra.gmra.mrb[38].mxu0 %v274_v61  ;;  %771 = vperm.xlu1 %2861, %v749_v0   ;;  %v2774_v61 = vpack.c.bf16 %v657_v51, %v656_v50  ;;  %v354_v0 = vld [vmem:[%s4630_s3 + $0x2c0] sm:$0xff]  ;;  %v681_v47 = vld [vmem:[%s4628_s5 + $0x7f8] sm:$0xff]  ;;  %v415_v48 = vld [vmem:[%s4630_s3 + $0x4a8] sm:$0xff] }
  0x87   :  { %1383 = vmatprep.mubr.f32.mxu1 %v277_v6  ;;  %2731 = vmatpush3.bf16.msra.mxu0 %v2730_v1  ;;  %v2744_v1 = vpack.c.bf16 %v643_v55, %v642_v54  ;;  %v78_v6 = vld [vmem:[%s4632_s1 + $0x10] sm:$0xff]  ;;  %v665_v51 = vld [vmem:[%s4628_s5 + $0x778] sm:$0xff]  ;;  %v698_v54 = vld [vmem:[%s4628_s5 + $0x880] sm:$0xff] }
  0x88   :  { %1384 = vmatmul.mubr.f32.vlgmr.msra.gmra.mrb[38].mxu1 %v276_v7  ;;  %2761 = vmatprep.subr.bf16.mxu1 %v2760_v4  ;;  %v2746_v7 = vpack.c.bf16 %v627_v59, %v626_v58  ;;  %v644_v4 = vld [vmem:[%s4628_s5 + $0x6d0] sm:$0xff]  ;;  %v699_v55 = vld [vmem:[%s4628_s5 + $0x888] sm:$0xff]  ;;  %v682_v58 = vld [vmem:[%s4628_s5 + $0x800] sm:$0xff] }
  0x89   :  { %1283 = vmatprep.mubr.f32.mxu0 %v295_v8  ;;  %2763 = vmatpush3.bf16.msra.mxu1 %v2762_v9  ;;  %v645_v8 = vld [vmem:[%s4628_s5 + $0x6d8] sm:$0xff]  ;;  %v664_v50 = vld [vmem:[%s4628_s5 + $0x770] sm:$0xff]  ;;  %v683_v59 = vld [vmem:[%s4628_s5 + $0x808] sm:$0xff] }
  0x8a   :  { %1284 = vmatmul.mubr.f32.gmra.mrb[40].mxu0 %v294_v12  ;;  %2733 = vmatprep.subr.bf16.mxu0 %v2732_v13  ;;  %v357_v9 = vld [vmem:[%s4630_s3 + $0x2d8] sm:$0xff]  ;;  %v356_v13 = vld [vmem:[%s4630_s3 + $0x2d0] sm:$0xff]  ;;  %v2748_v18 = vpack.c.bf16 %v645_v8, %v644_v4  ;;  %v715_v5 = vld [vmem:[%s4628_s5 + $0x908] sm:$0xff] }
  0x8b   :  { %781 = vperm.xlu1 %2861, %v751_v16   ;;  %1388 = vmatprep.mubr.f32.mxu1 %v297_v19  ;;  %v629_v12 = vld [vmem:[%s4628_s5 + $0x658] sm:$0xff]  ;;  %v660_v19 = vld [vmem:[%s4628_s5 + $0x750] sm:$0xff] }
  0x8c   :  { %2735 = vmatpush3.bf16.msra.mxu0 %v2734_v20  ;;  %1389 = vmatmul.mubr.f32.gmra.mrb[40].mxu1 %v296_v23  ;;  %v677_v16 = vld [vmem:[%s4628_s5 + $0x7d8] sm:$0xff]  ;;  %v2750_v22 = vpack.c.bf16 %v629_v12, %v628_v11  ;;  %v646_v23 = vld [vmem:[%s4628_s5 + $0x6e0] sm:$0xff]  ;;  %v700_v4 = vld [vmem:[%s4628_s5 + $0x890] sm:$0xff] }
  0x8d   :  { %2765 = vmatprep.subr.bf16.mxu1 %v2764_v24  ;;  %1288 = vmatprep.mubr.f32.mxu0 %v315_v26  ;;  %v661_v20 = vld [vmem:[%s4628_s5 + $0x758] sm:$0xff]  ;;  %v647_v24 = vld [vmem:[%s4628_s5 + $0x6e8] sm:$0xff]  ;;  %v2780_v25 = vpack.c.bf16 %v677_v16, %v676_v15  ;;  %v630_v26 = vld [vmem:[%s4628_s5 + $0x660] sm:$0xff] }
  0x8e   :  { %2767 = vmatpush3.bf16.msra.mxu1 %v2766_v27  ;;  %1289 = vmatmul.mubr.f32.gmra.mrb[42].mxu0 %v314_v30  ;;  %v631_v27 = vld [vmem:[%s4628_s5 + $0x668] sm:$0xff]  ;;  %v2782_v29 = vpack.c.bf16 %v661_v20, %v660_v19  ;;  %v678_v30 = vld [vmem:[%s4628_s5 + $0x7e0] sm:$0xff]  ;;  %v2752_v33 = vpack.c.bf16 %v647_v24, %v646_v23  ;;  %v701_v8 = vld [vmem:[%s4628_s5 + $0x898] sm:$0xff] }
  0x8f   :  { %2737 = vmatprep.subr.bf16.mxu0 %v2736_v31  ;;  %791 = vperm.xlu1 %2861, %v753_v34   ;;  %v679_v31 = vld [vmem:[%s4628_s5 + $0x7e8] sm:$0xff]  ;;  %v662_v34 = vld [vmem:[%s4628_s5 + $0x760] sm:$0xff]  ;;  %v2754_v37 = vpack.c.bf16 %v631_v27, %v630_v26  ;;  %v684_v11 = vld [vmem:[%s4628_s5 + $0x810] sm:$0xff] }
  0x90   :  { %1393 = vmatprep.mubr.f32.mxu1 %v317_v38  ;;  %2739 = vmatpush3.bf16.msra.mxu0 %v2738_v35  ;;  %v663_v35 = vld [vmem:[%s4628_s5 + $0x768] sm:$0xff]  ;;  %v648_v38 = vld [vmem:[%s4628_s5 + $0x6f0] sm:$0xff]  ;;  %v685_v12 = vld [vmem:[%s4628_s5 + $0x818] sm:$0xff] }
  0x91   :  { %1394 = vmatmul.mubr.f32.gmra.mrb[42].mxu1 %v316_v39  ;;  %2769 = vmatprep.subr.bf16.mxu1 %v2768_v40  ;;  %v649_v39 = vld [vmem:[%s4628_s5 + $0x6f8] sm:$0xff]  ;;  %v732_v15 = vld [vmem:[%s4628_s5 + $0x990] sm:$0xff]  ;;  %v702_v23 = vld [vmem:[%s4628_s5 + $0x8a0] sm:$0xff] }
  0x92   :  { %1293 = vmatprep.mubr.f32.mxu0 %v335_v41  ;;  %2771 = vmatpush3.bf16.msra.mxu1 %v2770_v42  ;;  %v397_v40 = vld [vmem:[%s4630_s3 + $0x418] sm:$0xff]  ;;  %v2784_v41 = vpack.c.bf16 %v679_v31, %v678_v30  ;;  %v632_v42 = vld [vmem:[%s4628_s5 + $0x670] sm:$0xff]  ;;  %v703_v24 = vld [vmem:[%s4628_s5 + $0x8a8] sm:$0xff] }
  0x93   :  { %1294 = vmatmul.mubr.f32.gmra.mrb[44].mxu0 %v334_v45  ;;  %2741 = vmatprep.subr.bf16.mxu0 %v2740_v46  ;;  %v2786_v45 = vpack.c.bf16 %v663_v35, %v662_v34  ;;  %v680_v46 = vld [vmem:[%s4628_s5 + $0x7f0] sm:$0xff]  ;;  %v733_v16 = vld [vmem:[%s4628_s5 + $0x998] sm:$0xff]  ;;  %v686_v26 = vld [vmem:[%s4628_s5 + $0x820] sm:$0xff] }
  0x94   :  { %86 = vperm.xlu1 %2861, %v77_v49   ;;  %1398 = vmatprep.mubr.f32.mxu1 %v337_v52  ;;  %v2756_v49 = vpack.c.bf16 %v649_v39, %v648_v38  ;;  %v414_v52 = vld [vmem:[%s4630_s3 + $0x4a0] sm:$0xff]  ;;  %v716_v19 = vld [vmem:[%s4628_s5 + $0x910] sm:$0xff]  ;;  %v717_v20 = vld [vmem:[%s4628_s5 + $0x918] sm:$0xff] }
  0x95   :  { %2743 = vmatpush3.bf16.msra.mxu0 %v2742_v53  ;;  %1399 = vmatmul.mubr.f32.gmra.mrb[44].mxu1 %v336_v56  ;;  %v2758_v53 = vpack.c.bf16 %v633_v43, %v632_v42  ;;  %v417_v56 = vld [vmem:[%s4630_s3 + $0x4b8] sm:$0xff]  ;;  %v687_v27 = vld [vmem:[%s4628_s5 + $0x828] sm:$0xff]  ;;  %v734_v30 = vld [vmem:[%s4628_s5 + $0x9a0] sm:$0xff] }
  0x96   :  { %2773 = vmatprep.subr.bf16.mxu1 %v2772_v57  ;;  %1298 = vmatprep.mubr.f32.mxu0 %v355_v60  ;;  %v2788_v57 = vpack.c.bf16 %v681_v47, %v680_v46  ;;  %v416_v60 = vld [vmem:[%s4630_s3 + $0x4b0] sm:$0xff]  ;;  %v735_v31 = vld [vmem:[%s4628_s5 + $0x9a8] sm:$0xff]  ;;  %v718_v34 = vld [vmem:[%s4628_s5 + $0x920] sm:$0xff] }
  0x97   :  { %2775 = vmatpush3.bf16.msra.mxu1 %v2774_v61  ;;  %1299 = vmatmul.mubr.f32.gmra.mrb[46].mxu0 %v354_v0  ;;  %v2790_v61 = vpack.c.bf16 %v665_v51, %v664_v50  ;;  %v279_v0 = vld [vmem:[%s4630_s3 + $0x68] sm:$0xff]  ;;  %v704_v38 = vld [vmem:[%s4628_s5 + $0x8b0] sm:$0xff]  ;;  %v705_v39 = vld [vmem:[%s4628_s5 + $0x8b8] sm:$0xff] }
  0x98   :  { %2745 = vmatprep.subr.bf16.mxu0 %v2744_v1  ;;  %91 = vperm.xlu0 %2860, %v78_v6   ;;  %v2792_v1 = vpack.c.bf16 %v699_v55, %v698_v54  ;;  %v278_v6 = vld [vmem:[%s4630_s3 + $0x60] sm:$0xff]  ;;  %v719_v35 = vld [vmem:[%s4628_s5 + $0x928] sm:$0xff]  ;;  %v688_v42 = vld [vmem:[%s4628_s5 + $0x830] sm:$0xff] }
  0x99   :  { %1403 = vmatprep.mubr.f32.mxu1 %v357_v9  ;;  %2747 = vmatpush3.bf16.msra.mxu0 %v2746_v7  ;;  %v2794_v7 = vpack.c.bf16 %v683_v59, %v682_v58  ;;  %v281_v9 = vld [vmem:[%s4630_s3 + $0x78] sm:$0xff]  ;;  %v736_v46 = vld [vmem:[%s4628_s5 + $0x9b0] sm:$0xff]  ;;  %v706_v54 = vld [vmem:[%s4628_s5 + $0x8c0] sm:$0xff] }
  0x9a   :  { %1404 = vmatmul.mubr.f32.gmra.mrb[46].mxu1 %v356_v13  ;;  %2777 = vmatprep.subr.bf16.mxu1 %v2776_v10  ;;  %v2824_v10 = vpack.c.bf16 %v731_v63, %v730_v62  ;;  %v280_v13 = vld [vmem:[%s4630_s3 + $0x70] sm:$0xff]  ;;  %v689_v43 = vld [vmem:[%s4628_s5 + $0x838] sm:$0xff]  ;;  %v707_v55 = vld [vmem:[%s4628_s5 + $0x8c8] sm:$0xff] }
  0x9b   :  { %1303 = vmatprep.mubr.f32.mxu0 %v375_v17  ;;  %2779 = vmatpush3.bf16.msra.mxu1 %v2778_v14  ;;  %v2826_v14 = vpack.c.bf16 %v715_v5, %v714_v2  ;;  %v299_v17 = vld [vmem:[%s4630_s3 + $0x108] sm:$0xff]  ;;  %v737_v47 = vld [vmem:[%s4628_s5 + $0x9b8] sm:$0xff]  ;;  %v720_v50 = vld [vmem:[%s4628_s5 + $0x930] sm:$0xff] }
  0x9c   :  { %1304 = vmatmul.mubr.f32.gmra.mrb[48].mxu0 %v374_v21  ;;  %2749 = vmatprep.subr.bf16.mxu0 %v2748_v18  ;;  %v2796_v18 = vpack.c.bf16 %v701_v8, %v700_v4  ;;  %v298_v21 = vld [vmem:[%s4630_s3 + $0x100] sm:$0xff]  ;;  %v721_v51 = vld [vmem:[%s4628_s5 + $0x938] sm:$0xff]  ;;  %v691_v59 = vld [vmem:[%s4628_s5 + $0x848] sm:$0xff] }
  0x9d   :  { %1408 = vmatprep.mubr.f32.mxu1 %v377_v3  ;;  %2751 = vmatpush3.bf16.msra.mxu0 %v2750_v22  ;;  %v2798_v22 = vpack.c.bf16 %v685_v12, %v684_v11  ;;  %v301_v3 = vld [vmem:[%s4630_s3 + $0x118] sm:$0xff]  ;;  %v690_v58 = vld [vmem:[%s4628_s5 + $0x840] sm:$0xff]  ;;  %v739_v63 = vld [vmem:[%s4628_s5 + $0x9c8] sm:$0xff] }
  0x9e   :  { %1409 = vmatmul.mubr.f32.gmra.mrb[48].mxu1 %v376_v28  ;;  %2781 = vmatprep.subr.bf16.mxu1 %v2780_v25  ;;  %v2828_v25 = vpack.c.bf16 %v733_v16, %v732_v15  ;;  %v300_v28 = vld [vmem:[%s4630_s3 + $0x110] sm:$0xff]  ;;  %v738_v62 = vld [vmem:[%s4628_s5 + $0x9c0] sm:$0xff]  ;;  %v723_v5 = vld [vmem:[%s4628_s5 + $0x948] sm:$0xff] }
  0x9f   :  { %1308 = vmatprep.mubr.f32.mxu0 %v395_v32  ;;  %2783 = vmatpush3.bf16.msra.mxu1 %v2782_v29  ;;  %v2830_v29 = vpack.c.bf16 %v717_v20, %v716_v19  ;;  %v319_v32 = vld [vmem:[%s4630_s3 + $0x1a8] sm:$0xff]  ;;  %v722_v2 = vld [vmem:[%s4628_s5 + $0x940] sm:$0xff]  ;;  %v708_v4 = vld [vmem:[%s4628_s5 + $0x8d0] sm:$0xff] }
  0xa0   :  { %1309 = vmatmul.mubr.f32.gmra.mrb[50].mxu0 %v394_v36  ;;  %2753 = vmatprep.subr.bf16.mxu0 %v2752_v33  ;;  %v2800_v33 = vpack.c.bf16 %v703_v24, %v702_v23  ;;  %v318_v36 = vld [vmem:[%s4630_s3 + $0x1a0] sm:$0xff]  ;;  %v709_v8 = vld [vmem:[%s4628_s5 + $0x8d8] sm:$0xff]  ;;  %v692_v11 = vld [vmem:[%s4628_s5 + $0x850] sm:$0xff] }
  0xa1   :  { %1413 = vmatprep.mubr.f32.mxu1 %v397_v40  ;;  %2755 = vmatpush3.bf16.msra.mxu0 %v2754_v37  ;;  %v2802_v37 = vpack.c.bf16 %v687_v27, %v686_v26  ;;  %v321_v40 = vld [vmem:[%s4630_s3 + $0x1b8] sm:$0xff]  ;;  %v740_v15 = vld [vmem:[%s4628_s5 + $0x9d0] sm:$0xff]  ;;  %v710_v23 = vld [vmem:[%s4628_s5 + $0x8e0] sm:$0xff] }
  0xa2   :  { %1414 = vmatmul.mubr.f32.gmra.mrb[50].mxu1 %v396_v44  ;;  %2785 = vmatprep.subr.bf16.mxu1 %v2784_v41  ;;  %v2832_v41 = vpack.c.bf16 %v735_v31, %v734_v30  ;;  %v320_v44 = vld [vmem:[%s4630_s3 + $0x1b0] sm:$0xff]  ;;  %v693_v12 = vld [vmem:[%s4628_s5 + $0x858] sm:$0xff]  ;;  %v711_v24 = vld [vmem:[%s4628_s5 + $0x8e8] sm:$0xff] }
  0xa3   :  { %1313 = vmatprep.mubr.f32.mxu0 %v415_v48  ;;  %2787 = vmatpush3.bf16.msra.mxu1 %v2786_v45  ;;  %v2834_v45 = vpack.c.bf16 %v719_v35, %v718_v34  ;;  %v339_v48 = vld [vmem:[%s4630_s3 + $0x248] sm:$0xff]  ;;  %v741_v16 = vld [vmem:[%s4628_s5 + $0x9d8] sm:$0xff]  ;;  %v724_v19 = vld [vmem:[%s4628_s5 + $0x950] sm:$0xff] }
  0xa4   :  { %1314 = vmatmul.mubr.f32.gmra.mrb[52].mxu0 %v414_v52  ;;  %2757 = vmatprep.subr.bf16.mxu0 %v2756_v49  ;;  %v2804_v49 = vpack.c.bf16 %v705_v39, %v704_v38  ;;  %v338_v52 = vld [vmem:[%s4630_s3 + $0x240] sm:$0xff]  ;;  %v725_v20 = vld [vmem:[%s4628_s5 + $0x958] sm:$0xff]  ;;  %v695_v27 = vld [vmem:[%s4628_s5 + $0x868] sm:$0xff] }
  0xa5   :  { %1418 = vmatprep.mubr.f32.mxu1 %v417_v56  ;;  %2759 = vmatpush3.bf16.msra.mxu0 %v2758_v53  ;;  %v2806_v53 = vpack.c.bf16 %v689_v43, %v688_v42  ;;  %v341_v56 = vld [vmem:[%s4630_s3 + $0x258] sm:$0xff]  ;;  %v694_v26 = vld [vmem:[%s4628_s5 + $0x860] sm:$0xff]  ;;  %v743_v31 = vld [vmem:[%s4628_s5 + $0x9e8] sm:$0xff] }
  0xa6   :  { %1419 = vmatmul.mubr.f32.gmra.mrb[52].mxu1 %v416_v60  ;;  %2789 = vmatprep.subr.bf16.mxu1 %v2788_v57  ;;  %v2836_v57 = vpack.c.bf16 %v737_v47, %v736_v46  ;;  %v340_v60 = vld [vmem:[%s4630_s3 + $0x250] sm:$0xff]  ;;  %v742_v30 = vld [vmem:[%s4628_s5 + $0x9e0] sm:$0xff]  ;;  %v727_v35 = vld [vmem:[%s4628_s5 + $0x968] sm:$0xff] }
  0xa7   :  { %1488 = vmatprep.mubr.f32.mxu0 %v279_v0  ;;  %2791 = vmatpush3.bf16.msra.mxu1 %v2790_v61  ;;  %v2838_v61 = vpack.c.bf16 %v721_v51, %v720_v50  ;;  %v359_v0 = vld [vmem:[%s4630_s3 + $0x2e8] sm:$0xff]  ;;  %v726_v34 = vld [vmem:[%s4628_s5 + $0x960] sm:$0xff]  ;;  %v712_v38 = vld [vmem:[%s4628_s5 + $0x8f0] sm:$0xff] }
  0xa8   :  { %1489 = vmatmul.mubr.f32.vlgmr.msra.gmra.mrb[54].mxu0 %v278_v6  ;;  %2793 = vmatprep.subr.bf16.mxu0 %v2792_v1  ;;  %v2808_v1 = vpack.c.bf16 %v707_v55, %v706_v54  ;;  %v358_v6 = vld [vmem:[%s4630_s3 + $0x2e0] sm:$0xff]  ;;  %v713_v39 = vld [vmem:[%s4628_s5 + $0x8f8] sm:$0xff]  ;;  %v696_v42 = vld [vmem:[%s4628_s5 + $0x870] sm:$0xff] }
  0xa9   :  { %1593 = vmatprep.mubr.f32.mxu1 %v281_v9  ;;  %2795 = vmatpush3.bf16.msra.mxu0 %v2794_v7  ;;  %v2810_v7 = vpack.c.bf16 %v691_v59, %v690_v58  ;;  %v361_v9 = vld [vmem:[%s4630_s3 + $0x2f8] sm:$0xff]  ;;  %v744_v46 = vld [vmem:[%s4628_s5 + $0x9f0] sm:$0xff]  ;;  %v283_v58 = vld [vmem:[%s4630_s3 + $0x88] sm:$0xff] }
  0xaa   :  { %1594 = vmatmul.mubr.f32.vlgmr.msra.gmra.mrb[54].mxu1 %v280_v13  ;;  %2825 = vmatprep.subr.bf16.mxu1 %v2824_v10  ;;  %v2840_v10 = vpack.c.bf16 %v739_v63, %v738_v62  ;;  %v360_v13 = vld [vmem:[%s4630_s3 + $0x2f0] sm:$0xff]  ;;  %v697_v43 = vld [vmem:[%s4628_s5 + $0x878] sm:$0xff]  ;;  %v282_v59 = vld [vmem:[%s4630_s3 + $0x80] sm:$0xff] }
  0xab   :  { %1493 = vmatprep.mubr.f32.mxu0 %v299_v17  ;;  %2827 = vmatpush3.bf16.msra.mxu1 %v2826_v14  ;;  %v2842_v14 = vpack.c.bf16 %v723_v5, %v722_v2  ;;  %v379_v17 = vld [vmem:[%s4630_s3 + $0x388] sm:$0xff]  ;;  %v745_v47 = vld [vmem:[%s4628_s5 + $0x9f8] sm:$0xff]  ;;  %v728_v50 = vld [vmem:[%s4628_s5 + $0x970] sm:$0xff] }
  0xac   :  { %1494 = vmatmul.mubr.f32.gmra.mrb[56].mxu0 %v298_v21  ;;  %2797 = vmatprep.subr.bf16.mxu0 %v2796_v18  ;;  %v2812_v18 = vpack.c.bf16 %v709_v8, %v708_v4  ;;  %v378_v21 = vld [vmem:[%s4630_s3 + $0x380] sm:$0xff]  ;;  %v729_v51 = vld [vmem:[%s4628_s5 + $0x978] sm:$0xff]  ;;  %v2852_v55 = vpack.c.bf16 %v745_v47, %v744_v46  ;;  %v284_v62 = vld [vmem:[%s4630_s3 + $0x90] sm:$0xff] }
  0xad   :  { %1598 = vmatprep.mubr.f32.mxu1 %v301_v3  ;;  %2799 = vmatpush3.bf16.msra.mxu0 %v2798_v22  ;;  %v2814_v22 = vpack.c.bf16 %v693_v12, %v692_v11  ;;  %v381_v3 = vld [vmem:[%s4630_s3 + $0x398] sm:$0xff]  ;;  %v304_v2 = vld [vmem:[%s4630_s3 + $0x130] sm:$0xff] }
  0xae   :  { %1599 = vmatmul.mubr.f32.gmra.mrb[56].mxu1 %v300_v28  ;;  %2829 = vmatprep.subr.bf16.mxu1 %v2828_v25  ;;  %v2844_v25 = vpack.c.bf16 %v741_v16, %v740_v15  ;;  %v380_v28 = vld [vmem:[%s4630_s3 + $0x390] sm:$0xff]  ;;  %v421_v54 = vld [vmem:[%s4630_s3 + $0x4d8] sm:$0xff] }
  0xaf   :  { %1498 = vmatprep.mubr.f32.mxu0 %v319_v32  ;;  %2831 = vmatpush3.bf16.msra.mxu1 %v2830_v29  ;;  %v2846_v29 = vpack.c.bf16 %v725_v20, %v724_v19  ;;  %v399_v32 = vld [vmem:[%s4630_s3 + $0x428] sm:$0xff]  ;;  %v305_v63 = vld [vmem:[%s4630_s3 + $0x138] sm:$0xff]  ;;  %v324_v4 = vld [vmem:[%s4630_s3 + $0x1d0] sm:$0xff] }
  0xb0   :  { %1499 = vmatmul.mubr.f32.gmra.mrb[58].mxu0 %v318_v36  ;;  %2801 = vmatprep.subr.bf16.mxu0 %v2800_v33  ;;  %v2816_v33 = vpack.c.bf16 %v711_v24, %v710_v23  ;;  %v398_v36 = vld [vmem:[%s4630_s3 + $0x420] sm:$0xff]  ;;  %v325_v5 = vld [vmem:[%s4630_s3 + $0x1d8] sm:$0xff]  ;;  %v344_v11 = vld [vmem:[%s4630_s3 + $0x270] sm:$0xff] }
  0xb1   :  { %1603 = vmatprep.mubr.f32.mxu1 %v321_v40  ;;  %2803 = vmatpush3.bf16.msra.mxu0 %v2802_v37  ;;  %v2818_v37 = vpack.c.bf16 %v695_v27, %v694_v26  ;;  %v401_v40 = vld [vmem:[%s4630_s3 + $0x438] sm:$0xff]  ;;  %v364_v15 = vld [vmem:[%s4630_s3 + $0x310] sm:$0xff] }
  0xb2   :  { %1604 = vmatmul.mubr.f32.gmra.mrb[58].mxu1 %v320_v44  ;;  %2833 = vmatprep.subr.bf16.mxu1 %v2832_v41  ;;  %v2848_v41 = vpack.c.bf16 %v743_v31, %v742_v30  ;;  %v400_v44 = vld [vmem:[%s4630_s3 + $0x430] sm:$0xff]  ;;  %v345_v8 = vld [vmem:[%s4630_s3 + $0x278] sm:$0xff] }
  0xb3   :  { %1503 = vmatprep.mubr.f32.mxu0 %v339_v48  ;;  %2835 = vmatpush3.bf16.msra.mxu1 %v2834_v45  ;;  %v2850_v45 = vpack.c.bf16 %v727_v35, %v726_v34  ;;  %v419_v48 = vld [vmem:[%s4630_s3 + $0x4c8] sm:$0xff]  ;;  %v365_v12 = vld [vmem:[%s4630_s3 + $0x318] sm:$0xff]  ;;  %v384_v19 = vld [vmem:[%s4630_s3 + $0x3b0] sm:$0xff] }
  0xb4   :  { %1504 = vmatmul.mubr.f32.gmra.mrb[60].mxu0 %v338_v52  ;;  %2805 = vmatprep.subr.bf16.mxu0 %v2804_v49  ;;  %v2820_v49 = vpack.c.bf16 %v713_v39, %v712_v38  ;;  %v418_v52 = vld [vmem:[%s4630_s3 + $0x4c0] sm:$0xff]  ;;  %v385_v16 = vld [vmem:[%s4630_s3 + $0x3b8] sm:$0xff]  ;;  %v404_v23 = vld [vmem:[%s4630_s3 + $0x450] sm:$0xff] }
  0xb5   :  { %1608 = vmatprep.mubr.f32.mxu1 %v341_v56  ;;  %2807 = vmatpush3.bf16.msra.mxu0 %v2806_v53  ;;  %v2822_v53 = vpack.c.bf16 %v697_v43, %v696_v42  ;;  %v420_v56 = vld [vmem:[%s4630_s3 + $0x4d0] sm:$0xff]  ;;  %v405_v20 = vld [vmem:[%s4630_s3 + $0x458] sm:$0xff] }
  0xb6   :  { %1609 = vmatmul.mubr.f32.gmra.mrb[60].mxu1 %v340_v60  ;;  %2837 = vmatprep.subr.bf16.mxu1 %v2836_v57  ;;  %v2854_v57 = vpack.c.bf16 %v729_v51, %v728_v50  ;;  %v285_v60 = vld [vmem:[%s4630_s3 + $0x98] sm:$0xff] }
  0xb7   :  { %1508 = vmatprep.mubr.f32.mxu0 %v359_v0  ;;  %2839 = vmatpush3.bf16.msra.mxu1 %v2838_v61  ;;  %v303_v61 = vld [vmem:[%s4630_s3 + $0x128] sm:$0xff]  ;;  %v302_v0 = vld [vmem:[%s4630_s3 + $0x120] sm:$0xff]  ;;  %v425_v24 = vld [vmem:[%s4630_s3 + $0x4f8] sm:$0xff] }
  0xb8   :  { %1509 = vmatmul.mubr.f32.gmra.mrb[62].mxu0 %v358_v6  ;;  %2809 = vmatprep.subr.bf16.mxu0 %v2808_v1  ;;  %v323_v1 = vld [vmem:[%s4630_s3 + $0x1c8] sm:$0xff]  ;;  %v322_v6 = vld [vmem:[%s4630_s3 + $0x1c0] sm:$0xff] }
  0xb9   :  { %1613 = vmatprep.mubr.f32.mxu1 %v361_v9  ;;  %2811 = vmatpush3.bf16.msra.mxu0 %v2810_v7  ;;  %v343_v7 = vld [vmem:[%s4630_s3 + $0x268] sm:$0xff]  ;;  %v342_v9 = vld [vmem:[%s4630_s3 + $0x260] sm:$0xff] }
  0xba   :  { %1614 = vmatmul.mubr.f32.gmra.mrb[62].mxu1 %v360_v13  ;;  %2841 = vmatprep.subr.bf16.mxu1 %v2840_v10  ;;  %v363_v10 = vld [vmem:[%s4630_s3 + $0x308] sm:$0xff]  ;;  %v362_v13 = vld [vmem:[%s4630_s3 + $0x300] sm:$0xff] }
  0xbb   :  { %1513 = vmatprep.mubr.f32.mxu0 %v379_v17  ;;  %2843 = vmatpush3.bf16.msra.mxu1 %v2842_v14  ;;  %v383_v14 = vld [vmem:[%s4630_s3 + $0x3a8] sm:$0xff]  ;;  %v382_v17 = vld [vmem:[%s4630_s3 + $0x3a0] sm:$0xff] }
  0xbc   :  { %1514 = vmatmul.mubr.f32.gmra.mrb[64].mxu0 %v378_v21  ;;  %2813 = vmatprep.subr.bf16.mxu0 %v2812_v18  ;;  %v403_v18 = vld [vmem:[%s4630_s3 + $0x448] sm:$0xff]  ;;  %v402_v21 = vld [vmem:[%s4630_s3 + $0x440] sm:$0xff] }
  0xbd   :  { %1618 = vmatprep.mubr.f32.mxu1 %v381_v3  ;;  %2815 = vmatpush3.bf16.msra.mxu0 %v2814_v22  ;;  %v423_v22 = vld [vmem:[%s4630_s3 + $0x4e8] sm:$0xff]  ;;  %v422_v3 = vld [vmem:[%s4630_s3 + $0x4e0] sm:$0xff] }
  0xbe   :  { %1619 = vmatmul.mubr.f32.gmra.mrb[64].mxu1 %v380_v28  ;;  %2845 = vmatprep.subr.bf16.mxu1 %v2844_v25  ;;  %v424_v25 = vld [vmem:[%s4630_s3 + $0x4f0] sm:$0xff] }
  0xbf   :  { %1518 = vmatprep.mubr.f32.mxu0 %v399_v32  ;;  %2847 = vmatpush3.bf16.msra.mxu1 %v2846_v29 }
  0xc0   :  { %1519 = vmatmul.mubr.f32.gmra.mrb[66].mxu0 %v398_v36  ;;  %2817 = vmatprep.subr.bf16.mxu0 %v2816_v33 }
  0xc1   :  { %1623 = vmatprep.mubr.f32.mxu1 %v401_v40  ;;  %2819 = vmatpush3.bf16.msra.mxu0 %v2818_v37 }
  0xc2   :  { %1624 = vmatmul.mubr.f32.gmra.mrb[66].mxu1 %v400_v44  ;;  %2849 = vmatprep.subr.bf16.mxu1 %v2848_v41 }
  0xc3   :  { %1523 = vmatprep.mubr.f32.mxu0 %v419_v48  ;;  %2851 = vmatpush3.bf16.msra.mxu1 %v2850_v45 }
  0xc4   :  { %1524 = vmatmul.mubr.f32.gmra.mrb[68].mxu0 %v418_v52  ;;  %2821 = vmatprep.subr.bf16.mxu0 %v2820_v49 }
  0xc5   :  { %1628 = vmatprep.mubr.f32.mxu1 %v421_v54  ;;  %2823 = vmatpush3.bf16.msra.mxu0 %v2822_v53 }
  0xc6   :  { %1629 = vmatmul.mubr.f32.gmra.mrb[68].mxu1 %v420_v56  ;;  %2853 = vmatprep.subr.bf16.mxu1 %v2852_v55 }
  0xc7   :  { %1698 = vmatprep.mubr.f32.mxu0 %v283_v58  ;;  %2855 = vmatpush3.bf16.msra.mxu1 %v2854_v57 }
  0xc8   :  { %1699 = vmatmul.mubr.f32.vlgmr.msra.gmra.mrb[70].mxu0 %v282_v59  ;;  %1803 = vmatprep.mubr.f32.mxu1 %v285_v60 }
  0xc9   :  { %1703 = vmatprep.mubr.f32.mxu0 %v303_v61 }
  0xca   :  { %1804 = vmatmul.mubr.f32.vlgmr.msra.gmra.mrb[70].mxu1 %v284_v62 }
  0xcb   :  { %1808 = vmatprep.mubr.f32.mxu1 %v305_v63 }
  0xcc   :  { %1704 = vmatmul.mubr.f32.gmra.mrb[72].mxu0 %v302_v0 }
  0xcd   :  { %1708 = vmatprep.mubr.f32.mxu0 %v323_v1 }
  0xce   :  { %1809 = vmatmul.mubr.f32.gmra.mrb[72].mxu1 %v304_v2 }
  0xcf   :  { %1813 = vmatprep.mubr.f32.mxu1 %v325_v5 }
  0xd0   :  { %1709 = vmatmul.mubr.f32.gmra.mrb[74].mxu0 %v322_v6 }
  0xd1   :  { %1713 = vmatprep.mubr.f32.mxu0 %v343_v7 }
  0xd2   :  { %1814 = vmatmul.mubr.f32.gmra.mrb[74].mxu1 %v324_v4 }
  0xd3   :  { %1818 = vmatprep.mubr.f32.mxu1 %v345_v8 }
  0xd4   :  { %1714 = vmatmul.mubr.f32.gmra.mrb[76].mxu0 %v342_v9 }
  0xd5   :  { %1718 = vmatprep.mubr.f32.mxu0 %v363_v10 }
  0xd6   :  { %1819 = vmatmul.mubr.f32.gmra.mrb[76].mxu1 %v344_v11 }
  0xd7   :  { %1823 = vmatprep.mubr.f32.mxu1 %v365_v12 }
  0xd8   :  { %1719 = vmatmul.mubr.f32.gmra.mrb[78].mxu0 %v362_v13 }
  0xd9   :  { %1723 = vmatprep.mubr.f32.mxu0 %v383_v14 }
  0xda   :  { %1824 = vmatmul.mubr.f32.gmra.mrb[78].mxu1 %v364_v15 }
  0xdb   :  { %1828 = vmatprep.mubr.f32.mxu1 %v385_v16 }
  0xdc   :  { %1724 = vmatmul.mubr.f32.gmra.mrb[80].mxu0 %v382_v17 }
  0xdd   :  { %1728 = vmatprep.mubr.f32.mxu0 %v403_v18 }
  0xde   :  { %1829 = vmatmul.mubr.f32.gmra.mrb[80].mxu1 %v384_v19 }
  0xdf   :  { %1833 = vmatprep.mubr.f32.mxu1 %v405_v20 }
  0xe0   :  { %1729 = vmatmul.mubr.f32.gmra.mrb[82].mxu0 %v402_v21 }
  0xe1   :  { %1733 = vmatprep.mubr.f32.mxu0 %v423_v22 }
  0xe2   :  { %1834 = vmatmul.mubr.f32.gmra.mrb[82].mxu1 %v404_v23 }
  0xe3   :  { %1838 = vmatprep.mubr.f32.mxu1 %v425_v24  ;;  %v757_v26 = vpop.permute.xlu0 %756 }
  0xe4   :  { %1734 = vmatmul.mubr.f32.gmra.mrb[84].mxu0 %v422_v3 }
  0xe6   :  { %1839 = vmatmul.mubr.f32.gmra.mrb[84].mxu1 %v424_v25 }
  0xea   :  { %v762_v27 = vpop.permute.xlu0 %761 }
  0xef   :  { %v4549_v28 = vpop.permute.xlu0 %776 }
  0xf4   :  { %v4551_v29 = vpop.permute.xlu0 %786 }
  0xf7   :  { %v160_v30 = vpop.f32.mrb[0].mxu0  ;;  %v243_v31 = vpop.f32.mrb[0].mxu1 }
  0xf8   :  { %v82_v32 = vpop.permute.xlu0 %81  ;;  %v162_v33 = vpop.f32.mrb[1].mxu0 }
  0xf9   :  { %v161_v34 = vadd.f32 %v160_v30, %v82_v32  ;;  %v163_v35 = vadd.f32 %v162_v33, %v82_v32  ;;  %v244_v36 = vadd.f32 %v243_v31, %v82_v32  ;;  %v2473_v37 = vpop.f32.mrb[1].mxu1 }
  0xfb   :  { %257 = vst [vmem:[%s4633_s6] sm:$0xff] %v161_v34  ;;  %258 = vst [vmem:[%s4633_s6 + $0x8] sm:$0xff] %v163_v35  ;;  %v166_v38 = vpop.f32.mrb[2].mxu0  ;;  %v248_v39 = vpop.f32.mrb[2].mxu1 }
  0xfc   :  { %259 = vst [vmem:[%s4633_s6 + $0x10] sm:$0xff] %v244_v36  ;;  %v168_v40 = vpop.f32.mrb[3].mxu0  ;;  %v2476_v41 = vpop.f32.mrb[3].mxu1 }
  0xff   :  { %v172_v42 = vpop.f32.mrb[4].mxu0  ;;  %v253_v43 = vpop.f32.mrb[4].mxu1 }
 0x100   :  { %v174_v44 = vpop.f32.mrb[5].mxu0  ;;  %v2479_v45 = vpop.f32.mrb[5].mxu1 }
 0x101   :  { %v767_v46 = vpop.permute.xlu1 %766 }
 0x105   :  { %v772_v47 = vpop.permute.xlu1 %771 }
 0x10a   :  { %v782_v48 = vpop.permute.xlu1 %781 }
 0x10e   :  { %v4562_v49 = vpop.permute.xlu1 %791 }
 0x113   :  { %v87_v50 = vpop.permute.xlu1 %86 }
 0x114   :  { %v167_v51 = vadd.f32 %v166_v38, %v87_v50  ;;  %v169_v52 = vadd.f32 %v168_v40, %v87_v50  ;;  %v249_v53 = vadd.f32 %v248_v39, %v87_v50 }
 0x116   :  { %260 = vst [vmem:[%s4633_s6 + $0x18] sm:$0xff] %v167_v51  ;;  %261 = vst [vmem:[%s4633_s6 + $0x20] sm:$0xff] %v169_v52 }
 0x117   :  { %262 = vst [vmem:[%s4633_s6 + $0x28] sm:$0xff] %v249_v53  ;;  %v92_v54 = vpop.permute.xlu0 %91  ;;  %v1911_v55 = vpop.f32.mrb[6].mxu0 }
 0x118   :  { %v173_v56 = vadd.f32 %v172_v42, %v92_v54  ;;  %v175_v57 = vadd.f32 %v174_v44, %v92_v54  ;;  %v254_v58 = vadd.f32 %v253_v43, %v92_v54  ;;  %v1912_v59 = vpop.f32.mrb[7].mxu0  ;;  %v1967_v60 = vpop.f32.mrb[6].mxu1 }
 0x119   :  { %v1913_v61 = vadd.f32 %v1912_v59, %v1911_v55  ;;  %v1968_v62 = vpop.f32.mrb[7].mxu1 }
 0x11a   :  { %263 = vst [vmem:[%s4633_s6 + $0x30] sm:$0xff] %v173_v56  ;;  %264 = vst [vmem:[%s4633_s6 + $0x38] sm:$0xff] %v175_v57  ;;  %v1969_v63 = vadd.f32 %v1968_v62, %v1967_v60 }
 0x11b   :  { %265 = vst [vmem:[%s4633_s6 + $0x40] sm:$0xff] %v254_v58  ;;  %v861_v0 = vadd.f32 %v1913_v61, %v757_v26  ;;  %v1914_v1 = vpop.f32.mrb[8].mxu0  ;;  %v1970_v2 = vpop.f32.mrb[8].mxu1 }
 0x11c   :  { %v1915_v5 = vpop.f32.mrb[9].mxu0  ;;  %v1971_v6 = vpop.f32.mrb[9].mxu1 }
 0x11d   :  { %v966_v7 = vadd.f32 %v1969_v63, %v861_v0  ;;  %v1916_v4 = vadd.f32 %v1915_v5, %v1914_v1  ;;  %v1972_v8 = vadd.f32 %v1971_v6, %v1970_v2 }
 0x11f   :  { %v866_v9 = vadd.f32 %v1916_v4, %v762_v27  ;;  %v1917_v10 = vpop.f32.mrb[10].mxu0  ;;  %v1973_v11 = vpop.f32.mrb[10].mxu1 }
 0x120   :  { %v1918_v12 = vpop.f32.mrb[11].mxu0  ;;  %v1974_v13 = vpop.f32.mrb[11].mxu1 }
 0x121   :  { %v971_v14 = vadd.f32 %v1972_v8, %v866_v9  ;;  %v1919_v15 = vadd.f32 %v1918_v12, %v1917_v10  ;;  %v1975_v16 = vadd.f32 %v1974_v13, %v1973_v11 }
 0x123   :  { %v871_v17 = vadd.f32 %v1919_v15, %v767_v46  ;;  %v1920_v18 = vpop.f32.mrb[12].mxu0  ;;  %v1976_v19 = vpop.f32.mrb[12].mxu1 }
 0x124   :  { %v1921_v20 = vpop.f32.mrb[13].mxu0  ;;  %v1977_v21 = vpop.f32.mrb[13].mxu1 }
 0x125   :  { %v976_v22 = vadd.f32 %v1975_v16, %v871_v17  ;;  %v1922_v23 = vadd.f32 %v1921_v20, %v1920_v18  ;;  %v1978_v24 = vadd.f32 %v1977_v21, %v1976_v19 }
 0x127   :  { %v876_v3 = vadd.f32 %v1922_v23, %v772_v47  ;;  %v1923_v25 = vpop.f32.mrb[14].mxu0  ;;  %v1979_v26 = vpop.f32.mrb[14].mxu1 }
 0x128   :  { %v1924_v30 = vpop.f32.mrb[15].mxu0  ;;  %v1980_v27 = vpop.f32.mrb[15].mxu1 }
 0x129   :  { %v981_v31 = vadd.f32 %v1978_v24, %v876_v3  ;;  %v1925_v32 = vadd.f32 %v1924_v30, %v1923_v25  ;;  %v1981_v33 = vadd.f32 %v1980_v27, %v1979_v26 }
 0x12b   :  { %v881_v34 = vadd.f32 %v1925_v32, %v4549_v28  ;;  %v1926_v35 = vpop.f32.mrb[16].mxu0  ;;  %v1982_v36 = vpop.f32.mrb[16].mxu1 }
 0x12c   :  { %v1927_v37 = vpop.f32.mrb[17].mxu0  ;;  %v1983_v38 = vpop.f32.mrb[17].mxu1 }
 0x12d   :  { %v986_v39 = vadd.f32 %v1981_v33, %v881_v34  ;;  %v1928_v40 = vadd.f32 %v1927_v37, %v1926_v35  ;;  %v1984_v41 = vadd.f32 %v1983_v38, %v1982_v36 }
 0x12f   :  { %v886_v42 = vadd.f32 %v1928_v40, %v782_v48  ;;  %v1929_v43 = vpop.f32.mrb[18].mxu0  ;;  %v1985_v44 = vpop.f32.mrb[18].mxu1 }
 0x130   :  { %v1930_v45 = vpop.f32.mrb[19].mxu0  ;;  %v1986_v46 = vpop.f32.mrb[19].mxu1 }
 0x131   :  { %v991_v47 = vadd.f32 %v1984_v41, %v886_v42  ;;  %v1931_v50 = vadd.f32 %v1930_v45, %v1929_v43  ;;  %v1987_v51 = vadd.f32 %v1986_v46, %v1985_v44 }
 0x133   :  { %v891_v52 = vadd.f32 %v1931_v50, %v4551_v29  ;;  %v1932_v53 = vpop.f32.mrb[20].mxu0  ;;  %v1988_v54 = vpop.f32.mrb[20].mxu1 }
 0x134   :  { %v1933_v28 = vpop.f32.mrb[21].mxu0  ;;  %v1989_v55 = vpop.f32.mrb[21].mxu1 }
 0x135   :  { %v996_v56 = vadd.f32 %v1987_v51, %v891_v52  ;;  %v1934_v57 = vadd.f32 %v1933_v28, %v1932_v53  ;;  %v1990_v58 = vadd.f32 %v1989_v55, %v1988_v54 }
 0x137   :  { %v896_v59 = vadd.f32 %v1934_v57, %v4562_v49  ;;  %v2023_v60 = vpop.f32.mrb[22].mxu0 }
 0x138   :  { %v2024_v48 = vpop.f32.mrb[23].mxu0  ;;  %v2079_v61 = vpop.f32.mrb[22].mxu1 }
 0x139   :  { %v1001_v62 = vadd.f32 %v1990_v58, %v896_v59  ;;  %v2025_v63 = vadd.f32 %v2024_v48, %v2023_v60  ;;  %v2080_v0 = vpop.f32.mrb[23].mxu1 }
 0x13a   :  { %v2081_v1 = vadd.f32 %v2080_v0, %v2079_v61 }
 0x13b   :  { %v1071_v2 = vadd.f32 %v2025_v63, %v966_v7  ;;  %v2026_v5 = vpop.f32.mrb[24].mxu0 }
 0x13c   :  { %v2027_v6 = vpop.f32.mrb[25].mxu0  ;;  %v2082_v29 = vpop.f32.mrb[24].mxu1 }
 0x13d   :  { %v1176_v4 = vadd.f32 %v2081_v1, %v1071_v2  ;;  %v2028_v8 = vadd.f32 %v2027_v6, %v2026_v5  ;;  %v2083_v9 = vpop.f32.mrb[25].mxu1 }
 0x13e   :  { %v2084_v10 = vadd.f32 %v2083_v9, %v2082_v29 }
 0x13f   :  { %v1076_v11 = vadd.f32 %v2028_v8, %v971_v14  ;;  %v2029_v12 = vpop.f32.mrb[26].mxu0 }
 0x140   :  { %v2030_v13 = vpop.f32.mrb[27].mxu0  ;;  %v2085_v15 = vpop.f32.mrb[26].mxu1 }
 0x141   :  { %v1181_v49 = vadd.f32 %v2084_v10, %v1076_v11  ;;  %v2031_v16 = vadd.f32 %v2030_v13, %v2029_v12  ;;  %v2086_v17 = vpop.f32.mrb[27].mxu1 }
 0x142   :  { %v2087_v18 = vadd.f32 %v2086_v17, %v2085_v15 }
 0x143   :  { %v1081_v19 = vadd.f32 %v2031_v16, %v976_v22  ;;  %v2032_v20 = vpop.f32.mrb[28].mxu0 }
 0x144   :  { %v2033_v21 = vpop.f32.mrb[29].mxu0 }
 0x145   :  { %v1186_v23 = vadd.f32 %v2087_v18, %v1081_v19  ;;  %v2034_v7 = vadd.f32 %v2033_v21, %v2032_v20  ;;  %v2088_v24 = vpop.f32.mrb[28].mxu1 }
 0x146   :  { %v2089_v3 = vpop.f32.mrb[29].mxu1 }
 0x147   :  { %v1086_v25 = vadd.f32 %v2034_v7, %v981_v31  ;;  %v2090_v26 = vadd.f32 %v2089_v3, %v2088_v24  ;;  %v2035_v30 = vpop.f32.mrb[30].mxu0 }
 0x148   :  { %v2036_v27 = vpop.f32.mrb[31].mxu0 }
 0x149   :  { %v1191_v32 = vadd.f32 %v2090_v26, %v1086_v25  ;;  %v2037_v14 = vadd.f32 %v2036_v27, %v2035_v30  ;;  %v2091_v33 = vpop.f32.mrb[30].mxu1 }
 0x14a   :  { %v2092_v34 = vpop.f32.mrb[31].mxu1 }
 0x14b   :  { %v1091_v35 = vadd.f32 %v2037_v14, %v986_v39  ;;  %v2093_v36 = vadd.f32 %v2092_v34, %v2091_v33  ;;  %v2038_v37 = vpop.f32.mrb[32].mxu0 }
 0x14c   :  { %v2039_v38 = vpop.f32.mrb[33].mxu0 }
 0x14d   :  { %v1196_v40 = vadd.f32 %v2093_v36, %v1091_v35  ;;  %v2040_v22 = vadd.f32 %v2039_v38, %v2038_v37 }
 0x14e   :  { %v2094_v41 = vpop.f32.mrb[32].mxu1 }
 0x14f   :  { %v1096_v42 = vadd.f32 %v2040_v22, %v991_v47  ;;  %v2095_v43 = vpop.f32.mrb[33].mxu1 }
 0x150   :  { %v2096_v44 = vadd.f32 %v2095_v43, %v2094_v41  ;;  %v2041_v45 = vpop.f32.mrb[34].mxu0 }
 0x151   :  { %v2042_v46 = vpop.f32.mrb[35].mxu0 }
 0x152   :  { %v1201_v31 = vadd.f32 %v2096_v44, %v1096_v42  ;;  %v2043_v50 = vadd.f32 %v2042_v46, %v2041_v45  ;;  %v2097_v51 = vpop.f32.mrb[34].mxu1 }
 0x153   :  { %v2098_v52 = vpop.f32.mrb[35].mxu1 }
 0x154   :  { %v1101_v53 = vadd.f32 %v2043_v50, %v996_v56  ;;  %v2099_v54 = vadd.f32 %v2098_v52, %v2097_v51  ;;  %v2044_v28 = vpop.f32.mrb[36].mxu0 }
 0x155   :  { %v2045_v55 = vpop.f32.mrb[37].mxu0 }
 0x156   :  { %v1206_v39 = vadd.f32 %v2099_v54, %v1101_v53  ;;  %v2046_v57 = vadd.f32 %v2045_v55, %v2044_v28  ;;  %v2100_v58 = vpop.f32.mrb[36].mxu1 }
 0x157   :  { %v2101_v59 = vpop.f32.mrb[37].mxu1 }
 0x158   :  { %v1106_v60 = vadd.f32 %v2046_v57, %v1001_v62  ;;  %v2102_v48 = vadd.f32 %v2101_v59, %v2100_v58 }
 0x159   :  { %v2135_v61 = vpop.f32.mrb[38].mxu0 }
 0x15a   :  { %v1211_v47 = vadd.f32 %v2102_v48, %v1106_v60  ;;  %v2136_v63 = vpop.f32.mrb[39].mxu0 }
 0x15b   :  { %v2137_v0 = vadd.f32 %v2136_v63, %v2135_v61  ;;  %v2191_v1 = vpop.f32.mrb[38].mxu1 }
 0x15c   :  { %v2192_v2 = vpop.f32.mrb[39].mxu1 }
 0x15d   :  { %v1281_v5 = vadd.f32 %v2137_v0, %v1176_v4  ;;  %v2193_v6 = vadd.f32 %v2192_v2, %v2191_v1  ;;  %v2138_v29 = vpop.f32.mrb[40].mxu0 }
 0x15e   :  { %v2139_v8 = vpop.f32.mrb[41].mxu0 }
 0x15f   :  { %v1386_v56 = vadd.f32 %v2193_v6, %v1281_v5  ;;  %v2140_v9 = vadd.f32 %v2139_v8, %v2138_v29  ;;  %v2194_v10 = vpop.f32.mrb[40].mxu1 }
 0x160   :  { %v2195_v11 = vpop.f32.mrb[41].mxu1 }
 0x161   :  { %v1286_v12 = vadd.f32 %v2140_v9, %v1181_v49  ;;  %v2196_v13 = vadd.f32 %v2195_v11, %v2194_v10  ;;  %v2141_v15 = vpop.f32.mrb[42].mxu0 }
 0x162   :  { %v2142_v16 = vpop.f32.mrb[43].mxu0 }
 0x163   :  { %v1391_v62 = vadd.f32 %v2196_v13, %v1286_v12  ;;  %v2143_v17 = vadd.f32 %v2142_v16, %v2141_v15 }
 0x164   :  { %v2197_v18 = vpop.f32.mrb[42].mxu1 }
 0x165   :  { %v1291_v19 = vadd.f32 %v2143_v17, %v1186_v23  ;;  %v2198_v20 = vpop.f32.mrb[43].mxu1 }
 0x166   :  { %v2199_v21 = vadd.f32 %v2198_v20, %v2197_v18  ;;  %v2144_v7 = vpop.f32.mrb[44].mxu0 }
 0x167   :  { %v2145_v24 = vpop.f32.mrb[45].mxu0 }
 0x168   :  { %v1396_v4 = vadd.f32 %v2199_v21, %v1291_v19  ;;  %v2146_v3 = vadd.f32 %v2145_v24, %v2144_v7  ;;  %v2200_v25 = vpop.f32.mrb[44].mxu1 }
 0x169   :  { %v2201_v26 = vpop.f32.mrb[45].mxu1 }
 0x16a   :  { %v1296_v30 = vadd.f32 %v2146_v3, %v1191_v32  ;;  %v2202_v27 = vadd.f32 %v2201_v26, %v2200_v25  ;;  %v2147_v14 = vpop.f32.mrb[46].mxu0 }
 0x16b   :  { %v2148_v33 = vpop.f32.mrb[47].mxu0 }
 0x16c   :  { %v1401_v49 = vadd.f32 %v2202_v27, %v1296_v30  ;;  %v2149_v34 = vadd.f32 %v2148_v33, %v2147_v14 }
 0x16d   :  { %v2203_v35 = vpop.f32.mrb[46].mxu1 }
 0x16e   :  { %v1301_v36 = vadd.f32 %v2149_v34, %v1196_v40  ;;  %v2204_v37 = vpop.f32.mrb[47].mxu1 }
 0x16f   :  { %v2205_v38 = vadd.f32 %v2204_v37, %v2203_v35  ;;  %v2150_v22 = vpop.f32.mrb[48].mxu0 }
 0x170   :  { %v2151_v23 = vpop.f32.mrb[49].mxu0 }
 0x171   :  { %v1406_v41 = vadd.f32 %v2205_v38, %v1301_v36  ;;  %v2152_v42 = vadd.f32 %v2151_v23, %v2150_v22  ;;  %v2206_v43 = vpop.f32.mrb[48].mxu1 }
 0x172   :  { %v2207_v44 = vpop.f32.mrb[49].mxu1 }
 0x173   :  { %v1306_v45 = vadd.f32 %v2152_v42, %v1201_v31  ;;  %v2208_v46 = vadd.f32 %v2207_v44, %v2206_v43  ;;  %v2153_v50 = vpop.f32.mrb[50].mxu0 }
 0x174   :  { %v2154_v51 = vpop.f32.mrb[51].mxu0 }
 0x175   :  { %v1411_v32 = vadd.f32 %v2208_v46, %v1306_v45  ;;  %v2155_v52 = vadd.f32 %v2154_v51, %v2153_v50  ;;  %v2209_v53 = vpop.f32.mrb[50].mxu1 }
 0x176   :  { %v2210_v54 = vpop.f32.mrb[51].mxu1 }
 0x177   :  { %v1311_v28 = vadd.f32 %v2155_v52, %v1206_v39  ;;  %v2211_v55 = vadd.f32 %v2210_v54, %v2209_v53  ;;  %v2156_v57 = vpop.f32.mrb[52].mxu0 }
 0x178   :  { %v2157_v40 = vpop.f32.mrb[53].mxu0 }
 0x179   :  { %v1416_v58 = vadd.f32 %v2211_v55, %v1311_v28  ;;  %v2158_v59 = vadd.f32 %v2157_v40, %v2156_v57  ;;  %v2212_v60 = vpop.f32.mrb[52].mxu1 }
 0x17a   :  { %v2213_v48 = vpop.f32.mrb[53].mxu1 }
 0x17b   :  { %v1316_v61 = vadd.f32 %v2158_v59, %v1211_v47  ;;  %v2214_v63 = vadd.f32 %v2213_v48, %v2212_v60  ;;  %v2247_v0 = vpop.f32.mrb[54].mxu0 }
 0x17c   :  { %v2248_v1 = vpop.f32.mrb[55].mxu0 }
 0x17d   :  { %v1421_v31 = vadd.f32 %v2214_v63, %v1316_v61  ;;  %v2249_v2 = vadd.f32 %v2248_v1, %v2247_v0  ;;  %v2303_v5 = vpop.f32.mrb[54].mxu1 }
 0x17e   :  { %v2304_v6 = vpop.f32.mrb[55].mxu1 }
 0x17f   :  { %v1491_v29 = vadd.f32 %v2249_v2, %v1386_v56  ;;  %v2305_v8 = vadd.f32 %v2304_v6, %v2303_v5  ;;  %v2250_v9 = vpop.f32.mrb[56].mxu0 }
 0x180   :  { %v2251_v10 = vpop.f32.mrb[57].mxu0 }
 0x181   :  { %v1596_v39 = vadd.f32 %v2305_v8, %v1491_v29  ;;  %v2252_v11 = vadd.f32 %v2251_v10, %v2250_v9  ;;  %v2306_v12 = vpop.f32.mrb[56].mxu1 }
 0x182   :  { %v2307_v13 = vpop.f32.mrb[57].mxu1 }
 0x183   :  { %v1496_v15 = vadd.f32 %v2252_v11, %v1391_v62  ;;  %v2308_v16 = vadd.f32 %v2307_v13, %v2306_v12  ;;  %v2253_v17 = vpop.f32.mrb[58].mxu0 }
 0x184   :  { %v2254_v18 = vpop.f32.mrb[59].mxu0 }
 0x185   :  { %v1601_v47 = vadd.f32 %v2308_v16, %v1496_v15  ;;  %v2255_v19 = vadd.f32 %v2254_v18, %v2253_v17  ;;  %v2309_v20 = vpop.f32.mrb[58].mxu1 }
 0x186   :  { %v2310_v21 = vpop.f32.mrb[59].mxu1 }
 0x187   :  { %v1501_v7 = vadd.f32 %v2255_v19, %v1396_v4  ;;  %v2311_v24 = vadd.f32 %v2310_v21, %v2309_v20  ;;  %v2256_v3 = vpop.f32.mrb[60].mxu0 }
 0x188   :  { %v2257_v25 = vpop.f32.mrb[61].mxu0 }
 0x189   :  { %v4585_v56 = vadd.f32 %v2311_v24, %v1501_v7  ;;  %v2258_v26 = vadd.f32 %v2257_v25, %v2256_v3  ;;  %v2312_v30 = vpop.f32.mrb[60].mxu1 }
 0x18a   :  { %v2313_v27 = vpop.f32.mrb[61].mxu1 }
 0x18b   :  { %v1506_v14 = vadd.f32 %v2258_v26, %v1401_v49  ;;  %v2314_v33 = vadd.f32 %v2313_v27, %v2312_v30  ;;  %v2259_v34 = vpop.f32.mrb[62].mxu0 }
 0x18c   :  { %v2260_v62 = vpop.f32.mrb[63].mxu0 }
 0x18d   :  { %v4587_v35 = vadd.f32 %v2314_v33, %v1506_v14  ;;  %v2261_v36 = vadd.f32 %v2260_v62, %v2259_v34  ;;  %v2315_v37 = vpop.f32.mrb[62].mxu1 }
 0x18e   :  { %v2316_v38 = vpop.f32.mrb[63].mxu1 }
 0x18f   :  { %v1511_v22 = vadd.f32 %v2261_v36, %v1406_v41  ;;  %v2317_v23 = vadd.f32 %v2316_v38, %v2315_v37  ;;  %v2262_v4 = vpop.f32.mrb[64].mxu0 }
 0x190   :  { %v2263_v42 = vpop.f32.mrb[65].mxu0 }
 0x191   :  { %v4589_v43 = vadd.f32 %v2317_v23, %v1511_v22  ;;  %v2264_v44 = vadd.f32 %v2263_v42, %v2262_v4  ;;  %v2318_v45 = vpop.f32.mrb[64].mxu1 }
 0x192   :  { %v2319_v46 = vpop.f32.mrb[65].mxu1 }
 0x193   :  { %v1516_v50 = vadd.f32 %v2264_v44, %v1411_v32  ;;  %v2320_v51 = vadd.f32 %v2319_v46, %v2318_v45  ;;  %v2265_v49 = vpop.f32.mrb[66].mxu0 }
 0x194   :  { %v2266_v52 = vpop.f32.mrb[67].mxu0 }
 0x195   :  { %v4591_v53 = vadd.f32 %v2320_v51, %v1516_v50  ;;  %v2267_v54 = vadd.f32 %v2266_v52, %v2265_v49  ;;  %v2321_v28 = vpop.f32.mrb[66].mxu1 }
 0x196   :  { %v2322_v55 = vpop.f32.mrb[67].mxu1 }
 0x197   :  { %v1521_v57 = vadd.f32 %v2267_v54, %v1416_v58  ;;  %v2323_v40 = vadd.f32 %v2322_v55, %v2321_v28  ;;  %v2268_v41 = vpop.f32.mrb[68].mxu0 }
 0x198   :  { %v2269_v59 = vpop.f32.mrb[69].mxu0 }
 0x199   :  { %v4593_v60 = vadd.f32 %v2323_v40, %v1521_v57  ;;  %v2270_v48 = vadd.f32 %v2269_v59, %v2268_v41  ;;  %v2324_v61 = vpop.f32.mrb[68].mxu1 }
 0x19a   :  { %v2325_v63 = vpop.f32.mrb[69].mxu1 }
 0x19b   :  { %v1526_v0 = vadd.f32 %v2270_v48, %v1421_v31  ;;  %v2326_v1 = vadd.f32 %v2325_v63, %v2324_v61  ;;  %v2359_v32 = vpop.f32.mrb[70].mxu0 }
 0x19c   :  { %v2360_v2 = vpop.f32.mrb[71].mxu0 }
 0x19d   :  { %v4595_v5 = vadd.f32 %v2326_v1, %v1526_v0  ;;  %v2361_v6 = vadd.f32 %v2360_v2, %v2359_v32  ;;  %v2415_v29 = vpop.f32.mrb[70].mxu1 }
 0x19e   :  { %v2416_v8 = vpop.f32.mrb[71].mxu1 }
 0x19f   :  { %v1701_v9 = vadd.f32 %v2361_v6, %v1596_v39  ;;  %v2417_v10 = vadd.f32 %v2416_v8, %v2415_v29  ;;  %v2362_v58 = vpop.f32.mrb[72].mxu0 }
 0x1a0   :  { %v2363_v11 = vpop.f32.mrb[73].mxu0 }
 0x1a1   :  { %v1806_v12 = vadd.f32 %v2417_v10, %v1701_v9  ;;  %v2364_v13 = vadd.f32 %v2363_v11, %v2362_v58  ;;  %v2418_v15 = vpop.f32.mrb[72].mxu1 }
 0x1a2   :  { %v2419_v16 = vpop.f32.mrb[73].mxu1 }
 0x1a3   :  { %1844 = vst [vmem:[%s4634_s7] sm:$0xff] %v1806_v12  ;;  %v1706_v31 = vadd.f32 %v2364_v13, %v1601_v47  ;;  %v2420_v17 = vadd.f32 %v2419_v16, %v2418_v15  ;;  %v2365_v18 = vpop.f32.mrb[74].mxu0 }
 0x1a4   :  { %v2366_v19 = vpop.f32.mrb[75].mxu0 }
 0x1a5   :  { %v1811_v20 = vadd.f32 %v2420_v17, %v1706_v31  ;;  %v2367_v21 = vadd.f32 %v2366_v19, %v2365_v18  ;;  %v2421_v7 = vpop.f32.mrb[74].mxu1 }
 0x1a6   :  { %v2422_v24 = vpop.f32.mrb[75].mxu1 }
 0x1a7   :  { %1845 = vst [vmem:[%s4634_s7 + $0x8] sm:$0xff] %v1811_v20  ;;  %v1711_v39 = vadd.f32 %v2367_v21, %v4585_v56  ;;  %v2423_v3 = vadd.f32 %v2422_v24, %v2421_v7  ;;  %v2368_v25 = vpop.f32.mrb[76].mxu0 }
 0x1a8   :  { %v2369_v26 = vpop.f32.mrb[77].mxu0 }
 0x1a9   :  { %v1816_v30 = vadd.f32 %v2423_v3, %v1711_v39  ;;  %v2370_v27 = vadd.f32 %v2369_v26, %v2368_v25  ;;  %v2424_v14 = vpop.f32.mrb[76].mxu1 }
 0x1aa   :  { %v2425_v47 = vpop.f32.mrb[77].mxu1 }
 0x1ab   :  { %1846 = vst [vmem:[%s4634_s7 + $0x10] sm:$0xff] %v1816_v30  ;;  %v1716_v33 = vadd.f32 %v2370_v27, %v4587_v35  ;;  %v2426_v34 = vadd.f32 %v2425_v47, %v2424_v14  ;;  %v2371_v62 = vpop.f32.mrb[78].mxu0 }
 0x1ac   :  { %v2372_v36 = vpop.f32.mrb[79].mxu0 }
 0x1ad   :  { %v1821_v37 = vadd.f32 %v2426_v34, %v1716_v33  ;;  %v2373_v38 = vadd.f32 %v2372_v36, %v2371_v62  ;;  %v2427_v22 = vpop.f32.mrb[78].mxu1 }
 0x1ae   :  { %v2428_v56 = vpop.f32.mrb[79].mxu1 }
 0x1af   :  { %1847 = vst [vmem:[%s4634_s7 + $0x18] sm:$0xff] %v1821_v37  ;;  %v1721_v23 = vadd.f32 %v2373_v38, %v4589_v43  ;;  %v2429_v4 = vadd.f32 %v2428_v56, %v2427_v22  ;;  %v2374_v42 = vpop.f32.mrb[80].mxu0 }
 0x1b0   :  { %v2375_v44 = vpop.f32.mrb[81].mxu0 }
 0x1b1   :  { %v1826_v45 = vadd.f32 %v2429_v4, %v1721_v23  ;;  %v2376_v46 = vadd.f32 %v2375_v44, %v2374_v42  ;;  %v2430_v50 = vpop.f32.mrb[80].mxu1 }
 0x1b2   :  { %v2431_v35 = vpop.f32.mrb[81].mxu1 }
 0x1b3   :  { %1848 = vst [vmem:[%s4634_s7 + $0x20] sm:$0xff] %v1826_v45  ;;  %v1726_v51 = vadd.f32 %v2376_v46, %v4591_v53  ;;  %v2432_v49 = vadd.f32 %v2431_v35, %v2430_v50  ;;  %v2377_v52 = vpop.f32.mrb[82].mxu0 }
 0x1b4   :  { %v2378_v54 = vpop.f32.mrb[83].mxu0 }
 0x1b5   :  { %v1831_v28 = vadd.f32 %v2432_v49, %v1726_v51  ;;  %v2379_v55 = vadd.f32 %v2378_v54, %v2377_v52  ;;  %v2433_v57 = vpop.f32.mrb[82].mxu1 }
 0x1b6   :  { %v2434_v43 = vpop.f32.mrb[83].mxu1 }
 0x1b7   :  { %1849 = vst [vmem:[%s4634_s7 + $0x28] sm:$0xff] %v1831_v28  ;;  %v1731_v40 = vadd.f32 %v2379_v55, %v4593_v60  ;;  %v2435_v41 = vadd.f32 %v2434_v43, %v2433_v57  ;;  %v2380_v59 = vpop.f32.mrb[84].mxu0 }
 0x1b8   :  { %v2381_v48 = vpop.f32.mrb[85].mxu0 }
 0x1b9   :  { %v1836_v61 = vadd.f32 %v2435_v41, %v1731_v40  ;;  %v2382_v63 = vadd.f32 %v2381_v48, %v2380_v59  ;;  %v2436_v0 = vpop.f32.mrb[84].mxu1 }
 0x1ba   :  { %v2437_v53 = vpop.f32.mrb[85].mxu1 }
 0x1bb   :  { %1850 = vst [vmem:[%s4634_s7 + $0x30] sm:$0xff] %v1836_v61  ;;  %v1736_v1 = vadd.f32 %v2382_v63, %v4595_v5  ;;  %v2438_v32 = vadd.f32 %v2437_v53, %v2436_v0 }
 0x1bd   :  { %v1841_v2 = vadd.f32 %v2438_v32, %v1736_v1 }
 0x1bf   :  { %1851 = vst [vmem:[%s4634_s7 + $0x38] sm:$0xff] %v1841_v2 }

</bundles_post_ra>
